<compile_context>
chip_gen: v7x
topology: tpu7x:2x2x1
jax: 0.10.0
libtpu: 0.0.40
codegen_flags: <defaults>
</compile_context>

<pallas_src>
import functools

import jax
import jax.numpy as jnp
from jax.experimental import pallas as pl
from jax.experimental.pallas import tpu as pltpu


def _round_up(a, b):
    return ((a + b - 1) // b) * b


# ----------------------------------------------------------------------------
# Fused conv kernel: kh*kw accumulated shifted matmuls, f32 accumulator,
# optional fused gating, lane-dense (Cout, Hout*Wtile) store (NCHW-flat).
# ----------------------------------------------------------------------------
def _conv_taps_kernel(x_ref, w_ref, o_ref, *, kh, kw, stride, dilation,
                      hout, wtile, cout, gated, use_relu):
    # x_ref: (1, Hp, Wp, Cin) bf16   w_ref: (kh*kw, Cin, Ctot) bf16
    # o_ref: (1, Cout, hout*wtile)   (output dtype = input dtype, f32 here)
    xv = x_ref[0]                       # (Hp, Wp, Cin) bf16, lives in VMEM
    m = hout * wtile
    ctot = w_ref.shape[2]

    acc = jnp.zeros((m, ctot), jnp.float32)
    for i in range(kh):                 # static unrolled taps (kh*kw dots)
        for j in range(kw):
            h0 = i * dilation
            w0 = j * dilation
            if stride == 1:
                slab = xv[h0:h0 + hout, w0:w0 + wtile, :]
            else:
                # TODO(synk): strided in-kernel slice (stride>1) is not exercised
                # by the smoke test; large strides may need a different layout.
                slab = jax.lax.slice(
                    xv, (h0, w0, 0),
                    (h0 + (hout - 1) * stride + 1,
                     w0 + (wtile - 1) * stride + 1, xv.shape[2]),
                    (stride, stride, 1))
            # (hout, wtile, Cin) -> (hout*wtile, Cin); wtile is padded to a
            # multiple of 16 so this merge is tile-aligned for bf16 layouts.
            slab2 = slab.reshape(m, -1)
            acc = acc + jnp.dot(slab2, w_ref[i * kw + j],        # bf16 MXU, f32 acc
                                preferred_element_type=jnp.float32)

    # One transpose at the end: output tile is (Ctot, M) -> M (large) on lanes,
    # i.e. lane-dense stores, and the HBM result is already NCHW-flattened.
    res = acc.T
    if gated:
        feat = res[:cout]               # input_conv result
        gate = res[cout:]               # gating_conv result
        if use_relu:
            feat = jnp.maximum(feat, 0.0)
        res = feat * jax.nn.sigmoid(gate)   # f32 elementwise (EUP sigmoid; v5e-safe)
    o_ref[0] = res.astype(o_ref.dtype)


@functools.partial(
    jax.jit,
    static_argnames=("kh", "kw", "stride", "padding", "dilation",
                     "cout", "gated", "use_relu"))
def conv2d_forward(x, w_taps, *, kh, kw, stride, padding, dilation, cout,
                   gated, use_relu):
    """x: NCHW f32.  w_taps: (kh*kw, Cin, Ctot) bf16.  Returns NCHW."""
    n, cin, h, w = x.shape
    hout = (h + 2 * padding - dilation * (kh - 1) - 1) // stride + 1
    wout = (w + 2 * padding - dilation * (kw - 1) - 1) // stride + 1

    # Pad Wout up to a multiple of 16 so the in-kernel (hout, wtile, Cin) ->
    # (hout*wtile, Cin) merge is a layout-preserving reshape for bf16.
    wtile = _round_up(wout, 16)
    extra_w = (wtile - wout) * stride

    # Single fused relayout pass: NCHW -> NHWC, zero-pad, cast to bf16.
    # (This replaces the k^2-inflated im2col patch matrix entirely.)
    x_p = jnp.pad(
        x.transpose(0, 2, 3, 1),
        ((0, 0), (padding, padding), (padding, padding + extra_w), (0, 0))
    ).astype(jnp.bfloat16)
    hp, wp = x_p.shape[1], x_p.shape[2]
    ctot = w_taps.shape[2]

    kern = functools.partial(_conv_taps_kernel, kh=kh, kw=kw, stride=stride,
                             dilation=dilation, hout=hout, wtile=wtile,
                             cout=cout, gated=gated, use_relu=use_relu)

    # One grid step per batch element (whole-image VMEM tile; grid >= N steps so
    # v7x can shard across its 2 TensorCores).
    # TODO(synk): very large images (whole padded image > VMEM) would need
    # halo'd output-row tiling via manual DMA; not needed at these sizes.
    out = pl.pallas_call(
        kern,
        out_shape=jax.ShapeDtypeStruct((n, cout, hout * wtile), x.dtype),
        grid_spec=pltpu.PrefetchScalarGridSpec(
            num_scalar_prefetch=0,
            grid=(n,),
            in_specs=[
                pl.BlockSpec((1, hp, wp, cin), lambda b: (b, 0, 0, 0)),
                pl.BlockSpec((kh * kw, cin, ctot), lambda b: (0, 0, 0)),
            ],
            out_specs=pl.BlockSpec((1, cout, hout * wtile), lambda b: (b, 0, 0)),
        ),
        compiler_params=pltpu.CompilerParams(
            dimension_semantics=("parallel",)),
    )(x_p, w_taps)

    out = out.reshape(n, cout, hout, wtile)       # free: already NCHW ordering
    if wtile != wout:
        out = out[:, :, :, :wout]
    return out


# ----------------------------------------------------------------------------
# Conv2dLayer equivalent.
# ----------------------------------------------------------------------------
class Conv2dLayerPallas:
    """Mirrors Conv2dLayer(in_ch, out_ch, k, stride, padding, dilation,
    bias=False, weight_norm='none', use_gate, activation, output_gate)."""

    def __init__(self, key, in_channels, out_channels, kernel_size, stride,
                 padding=0, dilation=1, use_gate=False, activation_relu=False,
                 output_gate=False):
        self.kh = self.kw = kernel_size
        self.stride = stride
        self.padding = padding
        self.dilation = dilation
        self.use_gate = use_gate
        self.activation_relu = activation_relu
        self.output_gate = output_gate
        self.out_channels = out_channels

        # init_He: kaiming_normal_, mode='fan_out', nonlinearity='relu':
        # std = sqrt(2 / (Cout * kh * kw))
        fan_out = out_channels * kernel_size * kernel_size
        std = (2.0 / fan_out) ** 0.5
        k1, k2 = jax.random.split(key)
        wshape = (out_channels, in_channels, kernel_size, kernel_size)  # OIHW
        self.w_input = std * jax.random.normal(k1, wshape, jnp.float32)
        self.w_gating = std * jax.random.normal(k2, wshape, jnp.float32)
        # bias=False / weight_norm='none' are the Conv2dLayer defaults.
        # TODO(synk): bias=True and weight_norm 'sn'/'wn' are not implemented.

        # Precompute MXU-ready weights once: OIHW -> (kh*kw, Cin, Cout), bf16.
        def taps(wgt):
            return wgt.transpose(2, 3, 1, 0).reshape(
                kernel_size * kernel_size, in_channels, out_channels)

        if use_gate:
            # Fused (Cin, 2*Cout) weight: one wide matmul for feature + gate.
            self.w_taps = jnp.concatenate(
                [taps(self.w_input), taps(self.w_gating)], axis=-1
            ).astype(jnp.bfloat16)
        else:
            self.w_taps = taps(self.w_input).astype(jnp.bfloat16)

    def __call__(self, x):
        out = conv2d_forward(
            x, self.w_taps, kh=self.kh, kw=self.kw, stride=self.stride,
            padding=self.padding, dilation=self.dilation,
            cout=self.out_channels, gated=self.use_gate,
            use_relu=self.activation_relu)
        # TODO(synk): output_gate=True (also returning the gating map) not wired.
        return out


# ----------------------------------------------------------------------------
# Reference (plain JAX) for sanity checking.
# ----------------------------------------------------------------------------
def _ref_conv(x, w, stride, padding, dilation):
    return jax.lax.conv_general_dilated(
        x, w, window_strides=(stride, stride),
        padding=[(padding, padding), (padding, padding)],
        rhs_dilation=(dilation, dilation),
        dimension_numbers=("NCHW", "OIHW", "NCHW"),
        precision=jax.lax.Precision.HIGHEST)


if __name__ == "__main__":
    key = jax.random.PRNGKey(0)
    kx, kp = jax.random.split(key)

    # Small shapes consistent with the module: N=2, Cin=4, H=W=16.
    x = jax.random.normal(kx, (2, 4, 16, 16), jnp.float32)

    # Default Conv2dLayer path: plain conv, bias=False, no weight norm.
    layer = Conv2dLayerPallas(kp, in_channels=4, out_channels=8,
                              kernel_size=3, stride=1, padding=1)
    y = layer(x)
    jax.block_until_ready(y)
    y_ref = _ref_conv(x, layer.w_input, 1, 1, 1)
    assert y.shape == y_ref.shape == (2, 8, 16, 16)
    # bf16 MXU operands -> ~1e-2 relative error vs the f32 reference.
    assert jnp.allclose(y, y_ref, atol=5e-2, rtol=5e-2), \
        float(jnp.max(jnp.abs(y - y_ref)))

    # Gated path (use_gate=True, activation=None): F * sigmoid(G).
    glayer = Conv2dLayerPallas(kp, in_channels=4, out_channels=8,
                               kernel_size=3, stride=1, padding=1,
                               use_gate=True)
    yg = glayer(x)
    jax.block_until_ready(yg)
    yg_ref = _ref_conv(x, glayer.w_input, 1, 1, 1) * jax.nn.sigmoid(
        _ref_conv(x, glayer.w_gating, 1, 1, 1))
    assert jnp.allclose(yg, yg_ref, atol=5e-2, rtol=5e-2), \
        float(jnp.max(jnp.abs(yg - yg_ref)))

    print("KERNEL_OK")
</pallas_src>

<mosaic_0001>
module attributes {stable_mosaic.version = 11 : i64} {
  func.func @_conv_taps_kernel(%arg0: i32, %arg1: memref<1x18x18x4xbf16, #tpu.memory_space<vmem>>, %arg2: memref<9x4x8xbf16, #tpu.memory_space<vmem>>, %arg3: memref<1x8x256xf32, #tpu.memory_space<vmem>>) attributes {dimension_semantics = [#tpu.dimension_semantics<parallel>], iteration_bounds = array<i64: 2>, scalar_prefetch = 0 : i64, scratch_operands = 0 : i64, tpu.core_type = #tpu.core_type<tc>, window_params = [{transform_indices = @transform_0, window_bounds = array<i64: 1, 18, 18, 4>}, {pipeline_mode = #tpu.pipeline_mode<synchronous>, transform_indices = @transform_1, window_bounds = array<i64: 9, 4, 8>}, {transform_indices = @transform_2, window_bounds = array<i64: 1, 8, 256>}]} {
    %c0 = arith.constant 0 : index
    %c0_0 = arith.constant 0 : index
    %c0_1 = arith.constant 0 : index
    %c0_2 = arith.constant 0 : index
    %0 = vector.load %arg1[%c0, %c0_0, %c0_1, %c0_2] : memref<1x18x18x4xbf16, #tpu.memory_space<vmem>>, vector<1x18x18x4xbf16>
    %1 = vector.shape_cast %0 : vector<1x18x18x4xbf16> to vector<18x18x4xbf16>
    %cst = arith.constant 0.000000e+00 : f32
    %2 = vector.broadcast %cst : f32 to vector<256x8xf32>
    %3 = vector.extract_strided_slice %1 {offsets = [0, 0, 0], sizes = [16, 16, 4], strides = [1, 1, 1]} : vector<18x18x4xbf16> to vector<16x16x4xbf16>
    %4 = vector.shape_cast %3 : vector<16x16x4xbf16> to vector<256x4xbf16>
    %c0_3 = arith.constant 0 : index
    %c0_4 = arith.constant 0 : index
    %c0_5 = arith.constant 0 : index
    %5 = vector.load %arg2[%c0_3, %c0_4, %c0_5] : memref<9x4x8xbf16, #tpu.memory_space<vmem>>, vector<1x4x8xbf16>
    %6 = vector.shape_cast %5 : vector<1x4x8xbf16> to vector<4x8xbf16>
    %cst_6 = arith.constant dense<0.000000e+00> : vector<256x8xf32>
    %7 = tpu.matmul %4, %6, %cst_6 {dimension_numbers = #tpu.dot_dimension_numbers<[1], [0], [0], [1], [0, 0, 1, 1], [], []>} : vector<256x4xbf16>, vector<4x8xbf16>, vector<256x8xf32> -> vector<256x8xf32>
    %8 = arith.addf %2, %7 : vector<256x8xf32>
    %9 = vector.extract_strided_slice %1 {offsets = [0, 1, 0], sizes = [16, 16, 4], strides = [1, 1, 1]} : vector<18x18x4xbf16> to vector<16x16x4xbf16>
    %10 = vector.shape_cast %9 : vector<16x16x4xbf16> to vector<256x4xbf16>
    %c1 = arith.constant 1 : index
    %c0_7 = arith.constant 0 : index
    %c0_8 = arith.constant 0 : index
    %11 = vector.load %arg2[%c1, %c0_7, %c0_8] : memref<9x4x8xbf16, #tpu.memory_space<vmem>>, vector<1x4x8xbf16>
    %12 = vector.shape_cast %11 : vector<1x4x8xbf16> to vector<4x8xbf16>
    %cst_9 = arith.constant dense<0.000000e+00> : vector<256x8xf32>
    %13 = tpu.matmul %10, %12, %cst_9 {dimension_numbers = #tpu.dot_dimension_numbers<[1], [0], [0], [1], [0, 0, 1, 1], [], []>} : vector<256x4xbf16>, vector<4x8xbf16>, vector<256x8xf32> -> vector<256x8xf32>
    %14 = arith.addf %8, %13 : vector<256x8xf32>
    %15 = vector.extract_strided_slice %1 {offsets = [0, 2, 0], sizes = [16, 16, 4], strides = [1, 1, 1]} : vector<18x18x4xbf16> to vector<16x16x4xbf16>
    %16 = vector.shape_cast %15 : vector<16x16x4xbf16> to vector<256x4xbf16>
    %c2 = arith.constant 2 : index
    %c0_10 = arith.constant 0 : index
    %c0_11 = arith.constant 0 : index
    %17 = vector.load %arg2[%c2, %c0_10, %c0_11] : memref<9x4x8xbf16, #tpu.memory_space<vmem>>, vector<1x4x8xbf16>
    %18 = vector.shape_cast %17 : vector<1x4x8xbf16> to vector<4x8xbf16>
    %cst_12 = arith.constant dense<0.000000e+00> : vector<256x8xf32>
    %19 = tpu.matmul %16, %18, %cst_12 {dimension_numbers = #tpu.dot_dimension_numbers<[1], [0], [0], [1], [0, 0, 1, 1], [], []>} : vector<256x4xbf16>, vector<4x8xbf16>, vector<256x8xf32> -> vector<256x8xf32>
    %20 = arith.addf %14, %19 : vector<256x8xf32>
    %21 = vector.extract_strided_slice %1 {offsets = [1, 0, 0], sizes = [16, 16, 4], strides = [1, 1, 1]} : vector<18x18x4xbf16> to vector<16x16x4xbf16>
    %22 = vector.shape_cast %21 : vector<16x16x4xbf16> to vector<256x4xbf16>
    %c3 = arith.constant 3 : index
    %c0_13 = arith.constant 0 : index
    %c0_14 = arith.constant 0 : index
    %23 = vector.load %arg2[%c3, %c0_13, %c0_14] : memref<9x4x8xbf16, #tpu.memory_space<vmem>>, vector<1x4x8xbf16>
    %24 = vector.shape_cast %23 : vector<1x4x8xbf16> to vector<4x8xbf16>
    %cst_15 = arith.constant dense<0.000000e+00> : vector<256x8xf32>
    %25 = tpu.matmul %22, %24, %cst_15 {dimension_numbers = #tpu.dot_dimension_numbers<[1], [0], [0], [1], [0, 0, 1, 1], [], []>} : vector<256x4xbf16>, vector<4x8xbf16>, vector<256x8xf32> -> vector<256x8xf32>
    %26 = arith.addf %20, %25 : vector<256x8xf32>
    %27 = vector.extract_strided_slice %1 {offsets = [1, 1, 0], sizes = [16, 16, 4], strides = [1, 1, 1]} : vector<18x18x4xbf16> to vector<16x16x4xbf16>
    %28 = vector.shape_cast %27 : vector<16x16x4xbf16> to vector<256x4xbf16>
    %c4 = arith.constant 4 : index
    %c0_16 = arith.constant 0 : index
    %c0_17 = arith.constant 0 : index
    %29 = vector.load %arg2[%c4, %c0_16, %c0_17] : memref<9x4x8xbf16, #tpu.memory_space<vmem>>, vector<1x4x8xbf16>
    %30 = vector.shape_cast %29 : vector<1x4x8xbf16> to vector<4x8xbf16>
    %cst_18 = arith.constant dense<0.000000e+00> : vector<256x8xf32>
    %31 = tpu.matmul %28, %30, %cst_18 {dimension_numbers = #tpu.dot_dimension_numbers<[1], [0], [0], [1], [0, 0, 1, 1], [], []>} : vector<256x4xbf16>, vector<4x8xbf16>, vector<256x8xf32> -> vector<256x8xf32>
    %32 = arith.addf %26, %31 : vector<256x8xf32>
    %33 = vector.extract_strided_slice %1 {offsets = [1, 2, 0], sizes = [16, 16, 4], strides = [1, 1, 1]} : vector<18x18x4xbf16> to vector<16x16x4xbf16>
    %34 = vector.shape_cast %33 : vector<16x16x4xbf16> to vector<256x4xbf16>
    %c5 = arith.constant 5 : index
    %c0_19 = arith.constant 0 : index
    %c0_20 = arith.constant 0 : index
    %35 = vector.load %arg2[%c5, %c0_19, %c0_20] : memref<9x4x8xbf16, #tpu.memory_space<vmem>>, vector<1x4x8xbf16>
    %36 = vector.shape_cast %35 : vector<1x4x8xbf16> to vector<4x8xbf16>
    %cst_21 = arith.constant dense<0.000000e+00> : vector<256x8xf32>
    %37 = tpu.matmul %34, %36, %cst_21 {dimension_numbers = #tpu.dot_dimension_numbers<[1], [0], [0], [1], [0, 0, 1, 1], [], []>} : vector<256x4xbf16>, vector<4x8xbf16>, vector<256x8xf32> -> vector<256x8xf32>
    %38 = arith.addf %32, %37 : vector<256x8xf32>
    %39 = vector.extract_strided_slice %1 {offsets = [2, 0, 0], sizes = [16, 16, 4], strides = [1, 1, 1]} : vector<18x18x4xbf16> to vector<16x16x4xbf16>
    %40 = vector.shape_cast %39 : vector<16x16x4xbf16> to vector<256x4xbf16>
    %c6 = arith.constant 6 : index
    %c0_22 = arith.constant 0 : index
    %c0_23 = arith.constant 0 : index
    %41 = vector.load %arg2[%c6, %c0_22, %c0_23] : memref<9x4x8xbf16, #tpu.memory_space<vmem>>, vector<1x4x8xbf16>
    %42 = vector.shape_cast %41 : vector<1x4x8xbf16> to vector<4x8xbf16>
    %cst_24 = arith.constant dense<0.000000e+00> : vector<256x8xf32>
    %43 = tpu.matmul %40, %42, %cst_24 {dimension_numbers = #tpu.dot_dimension_numbers<[1], [0], [0], [1], [0, 0, 1, 1], [], []>} : vector<256x4xbf16>, vector<4x8xbf16>, vector<256x8xf32> -> vector<256x8xf32>
    %44 = arith.addf %38, %43 : vector<256x8xf32>
    %45 = vector.extract_strided_slice %1 {offsets = [2, 1, 0], sizes = [16, 16, 4], strides = [1, 1, 1]} : vector<18x18x4xbf16> to vector<16x16x4xbf16>
    %46 = vector.shape_cast %45 : vector<16x16x4xbf16> to vector<256x4xbf16>
    %c7 = arith.constant 7 : index
    %c0_25 = arith.constant 0 : index
    %c0_26 = arith.constant 0 : index
    %47 = vector.load %arg2[%c7, %c0_25, %c0_26] : memref<9x4x8xbf16, #tpu.memory_space<vmem>>, vector<1x4x8xbf16>
    %48 = vector.shape_cast %47 : vector<1x4x8xbf16> to vector<4x8xbf16>
    %cst_27 = arith.constant dense<0.000000e+00> : vector<256x8xf32>
    %49 = tpu.matmul %46, %48, %cst_27 {dimension_numbers = #tpu.dot_dimension_numbers<[1], [0], [0], [1], [0, 0, 1, 1], [], []>} : vector<256x4xbf16>, vector<4x8xbf16>, vector<256x8xf32> -> vector<256x8xf32>
    %50 = arith.addf %44, %49 : vector<256x8xf32>
    %51 = vector.extract_strided_slice %1 {offsets = [2, 2, 0], sizes = [16, 16, 4], strides = [1, 1, 1]} : vector<18x18x4xbf16> to vector<16x16x4xbf16>
    %52 = vector.shape_cast %51 : vector<16x16x4xbf16> to vector<256x4xbf16>
    %c8 = arith.constant 8 : index
    %c0_28 = arith.constant 0 : index
    %c0_29 = arith.constant 0 : index
    %53 = vector.load %arg2[%c8, %c0_28, %c0_29] : memref<9x4x8xbf16, #tpu.memory_space<vmem>>, vector<1x4x8xbf16>
    %54 = vector.shape_cast %53 : vector<1x4x8xbf16> to vector<4x8xbf16>
    %cst_30 = arith.constant dense<0.000000e+00> : vector<256x8xf32>
    %55 = tpu.matmul %52, %54, %cst_30 {dimension_numbers = #tpu.dot_dimension_numbers<[1], [0], [0], [1], [0, 0, 1, 1], [], []>} : vector<256x4xbf16>, vector<4x8xbf16>, vector<256x8xf32> -> vector<256x8xf32>
    %56 = arith.addf %50, %55 : vector<256x8xf32>
    %57 = tpu.transpose %56, [1, 0] : vector<256x8xf32> -> vector<8x256xf32>
    %c0_31 = arith.constant 0 : index
    %c0_32 = arith.constant 0 : index
    %c0_33 = arith.constant 0 : index
    %58 = vector.load %arg3[%c0_31, %c0_32, %c0_33] : memref<1x8x256xf32, #tpu.memory_space<vmem>>, vector<1x8x256xf32>
    %59 = vector.shape_cast %58 : vector<1x8x256xf32> to vector<8x256xf32>
    %60 = vector.shape_cast %57 : vector<8x256xf32> to vector<1x8x256xf32>
    tpu.vector_store %arg3[%c0_31, %c0_32, %c0_33], %60 {strides = array<i32>} : memref<1x8x256xf32, #tpu.memory_space<vmem>>, vector<1x8x256xf32>,
    return
  }
  func.func @transform_0(%arg0: i32) -> (i32, i32, i32, i32) {
    %c0_i32 = arith.constant 0 : i32
    %c0_i32_0 = arith.constant 0 : i32
    %c0_i32_1 = arith.constant 0 : i32
    %c0_i32_2 = arith.constant 0 : i32
    return %arg0, %c0_i32, %c0_i32_0, %c0_i32_1 : i32, i32, i32, i32
  }
  func.func @transform_1(%arg0: i32) -> (i32, i32, i32) {
    %c0_i32 = arith.constant 0 : i32
    %c0_i32_0 = arith.constant 0 : i32
    %c0_i32_1 = arith.constant 0 : i32
    %c0_i32_2 = arith.constant 0 : i32
    return %c0_i32, %c0_i32_0, %c0_i32_1 : i32, i32, i32
  }
  func.func @transform_2(%arg0: i32) -> (i32, i32, i32) {
    %c0_i32 = arith.constant 0 : i32
    %c0_i32_0 = arith.constant 0 : i32
    %c0_i32_1 = arith.constant 0 : i32
    return %arg0, %c0_i32, %c0_i32_0 : i32, i32, i32
  }
}

</mosaic_0001>

<bundles_post_ra>
// kernel: conv2d_forward.1
= control target key start
LH: loop header
LB: loop body
LE: loop exit
PB: predicated region body
PF: predicated region fallthrough
CT: control target
= control target key end

     0   :  { %s3997_s9 = smov 0   ;;  %s4973_s0 = inlined_call_operand.vmem [shape: bf16[2,18,18,4], index: 0, kind: input, shape index: {}]   ;;  %s4974_s1 = inlined_call_operand.vmem [shape: bf16[9,4,8], index: 1, kind: input, shape index: {}]   ;;  %s4975_s2 = inlined_call_operand.vmem [shape: f32[2,8,256], index: 2, kind: output, shape index: {}]  }
   0x1 LB: > { %s2981_s10 = sadd.s32 4294967295, %s3980_s9   ;;  %p2985_p0 = scmp.ge.s32.totalorder %s3980_s9, 1  ;;  %s3980_s9 = sphi %s3997_s9, %s12_s9  }
   0x2   : > { %p112_p1 = scmp.lt.s32.totalorder %s3980_s9, 3 }
   0x4   : > { %p113_p2 = pnand %p2985_p0, %p112_p1 }
   0x6   : > { %116 = sbr.rel (%p113_p2) target bundleno = 652 (0x28c), region = 28 }
   0xd   : > { %v2989_v0 = vld [vmem:[%s4974_s1 + $0x2] sm:$0x3]  ;;  %vm686_vm0 = vcmask 1041408   ;;  %v3121_v1 = vld [vmem:[%s4974_s1 + $0x8] sm:$0x3]  ;;  %p134_p3 = scmp.lt.s32.totalorder %s2981_s10, 1 }
   0xe   : > { %3933 = vmatprep.subr.msk.bf16.mxu1 %vm686_vm0, %v2989_v0  ;;  %3937 = vmatprep.subr.msk.bf16.mxu0 %vm686_vm0, %v3121_v1  ;;  %v688_v2 = vsel %vm686_vm0, %v2989_v0, 0  ;;  %v4015_v3 = vsel %vm686_vm0, %v3121_v1, 0  ;;  %v199_v4 = vld [vmem:[%s4974_s1] sm:$0x3]  ;;  %v3140_v5 = vld [vmem:[%s4974_s1 + $0xa] sm:$0x3] }
   0xf   : > { %5007 = vst [vmem:[#allocation2_spill] sm:$0xff] %v4015_v3  ;;  %3370 = vmatpush3.bf16.msra.mxu1 %v688_v2  ;;  %3506 = vmatpush3.bf16.msra.mxu0 %v4015_v3  ;;  %s5054_s10 = smov (!%p134_p3, %s2981_s10), 1  ;;  %vm200_vm1 = vsmask.f32 3328  ;;  %vm201_vm2 = vsmask.f32 7440 }
  0x10   : > { %3934 = vmatprep.subr.msk.bf16.mxu1 %vm686_vm0, %v199_v4  ;;  %3939 = vmatprep.subr.msk.bf16.mxu0 %vm686_vm0, %v3140_v5  ;;  %s3943_s19 = smul.u32 216, %s5054_s10  ;;  %v4035_v6 = vsel %vm686_vm0, %v199_v4, 0  ;;  %v4038_v7 = vsel %vm686_vm0, %v3140_v5, 0  ;;  %v4043_v8 = vld [vmem:[%s4974_s1 + $0xc] sm:$0x3]  ;;  %vm637_vm3 = vcmask 31744   ;;  %vm4079_vm4 = vmor %vm200_vm1, %vm201_vm2 }
  0x11   : > { %v4067_v20 = vsel %vm686_vm0, %v4043_v8, 0  ;;  %vm1159_vm5 = vcmask 1042432   ;;  %vm1160_vm6 = vcmask 1046532   ;;  %s3215_s7 = sshll.u32 %s5054_s10, 4 }
  0x12   : > { %s4032_s22 = scalar_lea.vmem %s4973_s0, %s3943_s19  ;;  %vm4260_vm7 = vmor %vm1159_vm5, %vm1160_vm6  ;;  %s143_s12 = scalar_lea.vmem %s4975_s2, %s3215_s7 }
  0x13   : > { %v4046_v9 = vld [vmem:[%s4032_s22] sm:$0xf]  ;;  %v4049_v10 = vld [vmem:[%s4032_s22 + $0x4] sm:$0xf]  ;;  %v147_v11 = vld [vmem:[%s4032_s22 + $0x8] sm:$0x1] }
  0x14   : > { %v204_v12 = vshrl.u32 %v4046_v9, 16  ;;  %v207_v13 = vshll.u32 %v4046_v9, 16  ;;  %v213_v14 = vshll.u32 %v4049_v10, 16  ;;  %v217_v15 = vshrl.u32 %v4049_v10, 16  ;;  %v4057_v16 = vld [vmem:[%s4032_s22 + $0xc] sm:$0xf] }
  0x15   : > { %v223_v17 = vshll.u32 %v147_v11, 16  ;;  %v4060_v18 = vld [vmem:[%s4032_s22 + $0x10] sm:$0xf]  ;;  %v4063_v19 = vld [vmem:[%s4032_s22 + $0x14] sm:$0x1]  ;;  %v228_v26 = vshrl.u32 %v4057_v16, 16 }
  0x16   : > { %v206_v21 = vrot.slane %v204_v12, 4  ;;  %v209_v22 = vrot.slane %v207_v13, 5  ;;  %v215_v23 = vrot.slane %v213_v14, 5  ;;  %v219_v24 = vrot.slane %v217_v15, 4  ;;  %v4075_v33 = vld [vmem:[%s4032_s22 + $0x18] sm:$0xf] }
  0x17   : > { %v225_v25 = vrot.slane %v223_v17, 5  ;;  %v231_v27 = vshll.u32 %v4057_v16, 16  ;;  %v237_v28 = vshll.u32 %v4060_v18, 16  ;;  %v241_v31 = vshrl.u32 %v4060_v18, 16  ;;  %v4088_v39 = vld [vmem:[%s4032_s22 + $0x1c] sm:$0xf] }
  0x18   : > { %v210_v29 = vor.u32 %v209_v22, %v206_v21  ;;  %v220_v30 = vor.u32 %v219_v24, %v215_v23  ;;  %v247_v32 = vshll.u32 %v4063_v19, 16  ;;  %v230_v35 = vrot.slane %v228_v26, 4  ;;  %v4092_v46 = vld [vmem:[%s4032_s22 + $0x20] sm:$0x1]  ;;  %v4102_v57 = vld [vmem:[%s4032_s22 + $0x24] sm:$0xf] }
  0x19   : > { %v233_v36 = vrot.slane %v231_v27, 5  ;;  %v239_v37 = vrot.slane %v237_v28, 5  ;;  %v4085_v38 = vcombine.low %v4057_v16, %v4060_v18  ;;  %v243_v42 = vrot.slane %v241_v31, 4  ;;  %v4107_v62 = vld [vmem:[%s4032_s22 + $0x28] sm:$0xf] }
  0x1a   : > { %v211_v40 = vrot.slane %v210_v29, 4  ;;  %v221_v41 = vrot.slane %v220_v30, 4  ;;  %v249_v43 = vrot.slane %v247_v32, 5  ;;  %v1174_v45 = vrot.slane %v4063_v19, 5  ;;  %v4115_v4 = vld [vmem:[%s4032_s22 + $0x2c] sm:$0x1] }
  0x1b   : > { %v234_v44 = vor.u32 %v233_v36, %v230_v35  ;;  %v252_v47 = vshrl.u32 %v4075_v33, 16  ;;  %v255_v48 = vshll.u32 %v4075_v33, 16  ;;  %v244_v51 = vor.u32 %v243_v42, %v239_v37  ;;  %v4121_v14 = vld [vmem:[%s4032_s22 + $0x30] sm:$0xf]  ;;  %v4133_v28 = vld [vmem:[%s4032_s22 + $0x34] sm:$0xf] }
  0x1c   : > { %v216_v49 = vsel %vm4079_vm4, %v211_v40, %v215_v23  ;;  %v226_v50 = vsel %vm4079_vm4, %v221_v41, %v225_v25  ;;  %v261_v52 = vshll.u32 %v4088_v39, 16  ;;  %v265_v60 = vshrl.u32 %v4088_v39, 16  ;;  %v4128_v23 = vld [vmem:[%s4974_s1 + $0x4] sm:$0x3]  ;;  %v4140_v32 = vld [vmem:[%s4032_s22 + $0x38] sm:$0x1] }
  0x1d   : > { %v2990_v53 = vcombine.low %v216_v49, %v226_v50  ;;  %v235_v54 = vrot.slane %v234_v44, 4  ;;  %v254_v55 = vrot.slane %v252_v47, 4  ;;  %v257_v56 = vrot.slane %v255_v48, 5  ;;  %v4148_v48 = vld [vmem:[%s4032_s22 + $0x3c] sm:$0xf] }
  0x1e   : > { %v245_v58 = vrot.slane %v244_v51, 4  ;;  %v263_v59 = vrot.slane %v261_v52, 5  ;;  %v271_v61 = vshll.u32 %v4092_v46, 16  ;;  %v1178_v1 = vrot.slane %v4088_v39, 5  ;;  %v4156_v52 = vld [vmem:[%s4032_s22 + $0x40] sm:$0xf] }
  0x1f   : > { %3371 = vmatprep.mubr.msk.bf16.mxu1 %vm637_vm3, %v2990_v53  ;;  %v240_v63 = vsel %vm4079_vm4, %v235_v54, %v239_v37  ;;  %v258_v0 = vor.u32 %v257_v56, %v254_v55  ;;  %v1181_v2 = vrot.slane %v4092_v46, 5  ;;  %v267_v11 = vrot.slane %v265_v60, 4 }
  0x20   : > { %v250_v5 = vsel %vm4079_vm4, %v245_v58, %v249_v43  ;;  %v273_v12 = vrot.slane %v271_v61, 5  ;;  %v276_v13 = vshrl.u32 %v4102_v57, 16  ;;  %v279_v21 = vshll.u32 %v4102_v57, 16 }
  0x21   : > { %v2991_v15 = vcombine.low %v240_v63, %v250_v5  ;;  %v259_v17 = vrot.slane %v258_v0, 4  ;;  %v285_v22 = vshll.u32 %v4107_v62, 16  ;;  %v268_v24 = vor.u32 %v267_v11, %v263_v59  ;;  %v4168_v5 = vld [vmem:[%s4032_s22 + $0x44] sm:$0x1] }
  0x22   : > { %v278_v25 = vrot.slane %v276_v13, 4  ;;  %v289_v26 = vshrl.u32 %v4107_v62, 16  ;;  %v295_v27 = vshll.u32 %v4115_v4, 16  ;;  %v281_v30 = vrot.slane %v279_v21, 5  ;;  %v4173_v13 = vld [vmem:[%s4032_s22 + $0x48] sm:$0xf] }
  0x23   : > { %3507 = vmatprep.mubr.msk.bf16.mxu0 %vm637_vm3, %v2991_v15  ;;  %3372 = vmatmul.mubr.msk.bf16.vlgmr.msra.gmra.mrb[0].mxu1 %vm637_vm3, %v2991_v15  ;;  %v264_v29 = vsel %vm4079_vm4, %v259_v17, %v263_v59  ;;  %v287_v31 = vrot.slane %v285_v22, 5  ;;  %v300_v35 = vshrl.u32 %v4121_v14, 16  ;;  %v269_v36 = vrot.slane %v268_v24, 4  ;;  %v4180_v24 = vld [vmem:[%s4032_s22 + $0x4c] sm:$0xf] }
  0x24   : > { %3404 = vmatpush3.bf16.msra.mxu1 %v4035_v6  ;;  %v291_v37 = vrot.slane %v289_v26, 4  ;;  %v297_v40 = vrot.slane %v295_v27, 5  ;;  %v303_v41 = vshll.u32 %v4121_v14, 16  ;;  %v282_v42 = vor.u32 %v281_v30, %v278_v25 }
  0x25   : > { %v302_v43 = vrot.slane %v300_v35, 4  ;;  %v309_v44 = vshll.u32 %v4133_v28, 16  ;;  %v313_v47 = vshrl.u32 %v4133_v28, 16  ;;  %3935 = vmatprep.subr.msk.bf16.mxu1 %vm686_vm0, %v4128_v23  ;;  %v274_v49 = vsel %vm4079_vm4, %v269_v36, %v273_v12 }
  0x26   : > { %v292_v6 = vor.u32 %v291_v37, %v287_v31  ;;  %v305_v50 = vrot.slane %v303_v41, 5  ;;  %v319_v51 = vshll.u32 %v4140_v32, 16  ;;  %v4158_v53 = vcombine.low %v264_v29, %v274_v49 }
  0x27   : > { %v283_v54 = vrot.slane %v282_v42, 4  ;;  %v311_v55 = vrot.slane %v309_v44, 5  ;;  %v315_v56 = vrot.slane %v313_v47, 4  ;;  %v324_v61 = vshrl.u32 %v4148_v48, 16  ;;  %v4202_v42 = vld [vmem:[%s4032_s22 + $0x54] sm:$0xf] }
  0x28   : > { %5010 = vst [vmem:[#allocation3_spill] sm:$0xff] %v4158_v53  ;;  %v293_v58 = vrot.slane %v292_v6, 4  ;;  %v306_v59 = vor.u32 %v305_v50, %v302_v43  ;;  %v321_v60 = vrot.slane %v319_v51, 5  ;;  %3508 = vmatmul.mubr.msk.bf16.vlgmr.msra.gmra.mrb[0].mxu0 %vm637_vm3, %v4158_v53  ;;  %3375 = vmatprep.mubr.msk.bf16.mxu1 %vm637_vm3, %v4158_v53  ;;  %v327_v11 = vshll.u32 %v4148_v48, 16  ;;  %5012 = vst [vmem:[#allocation5_spill] sm:$0xff] %v4202_v42 }
  0x29   : > { %v288_v63 = vsel %vm4079_vm4, %v283_v54, %v287_v31  ;;  %v316_v0 = vor.u32 %v315_v56, %v311_v55  ;;  %v333_v12 = vshll.u32 %v4156_v52, 16  ;;  %3540 = vmatpush3.bf16.msra.mxu0 %v4038_v7  ;;  %v326_v21 = vrot.slane %v324_v61, 4  ;;  %v4207_v6 = vld [vmem:[%s4032_s22 + $0x58] sm:$0xf] }
  0x2a   : > { %v298_v15 = vsel %vm4079_vm4, %v293_v58, %v297_v40  ;;  %v307_v17 = vrot.slane %v306_v59, 4  ;;  %v337_v22 = vshrl.u32 %v4156_v52, 16  ;;  %v329_v27 = vrot.slane %v327_v11, 5  ;;  %3940 = vmatprep.subr.msk.bf16.mxu0 %vm686_vm0, %v4043_v8  ;;  %v4197_v8 = vld [vmem:[%s4032_s22 + $0x50] sm:$0x1] }
  0x2b   : > { %v4182_v25 = vcombine.low %v288_v63, %v298_v15  ;;  %v317_v26 = vrot.slane %v316_v0, 4  ;;  %v335_v29 = vrot.slane %v333_v12, 5  ;;  %v343_v31 = vshll.u32 %v4168_v5, 16  ;;  %v4220_v11 = vld [vmem:[%s4032_s22 + $0x5c] sm:$0x1] }
  0x2c   : > { %v312_v7 = vsel %vm4079_vm4, %v307_v17, %v311_v55  ;;  %v339_v30 = vrot.slane %v337_v22, 4  ;;  %v348_v35 = vshrl.u32 %v4173_v13, 16  ;;  %v330_v37 = vor.u32 %v329_v27, %v326_v21  ;;  %v4224_v15 = vld [vmem:[%s4032_s22 + $0x60] sm:$0xf]  ;;  %v4229_v27 = vld [vmem:[%s4032_s22 + $0x64] sm:$0xf] }
  0x2d   : > { %5011 = vst [vmem:[#allocation4_spill] sm:$0xff] %v4182_v25  ;;  %3511 = vmatprep.mubr.msk.bf16.mxu0 %vm637_vm3, %v4182_v25  ;;  %3376 = vmatmul.mubr.msk.bf16.gmra.mrb[4].mxu1 %vm637_vm3, %v4182_v25  ;;  %v322_v36 = vsel %vm4079_vm4, %v317_v26, %v321_v60  ;;  %v351_v40 = vshll.u32 %v4173_v13, 16  ;;  %v357_v41 = vshll.u32 %v4180_v24, 16  ;;  %v345_v47 = vrot.slane %v343_v31, 5  ;;  %v4441_v25 = vld [vmem:[%s4032_s22 + $0xa8] sm:$0xf] }
  0x2e   : > { %v4204_v43 = vcombine.low %v312_v7, %v322_v36  ;;  %v340_v44 = vor.u32 %v339_v30, %v335_v29  ;;  %v350_v49 = vrot.slane %v348_v35, 4  ;;  %v331_v50 = vrot.slane %v330_v37, 4 }
  0x2f   : > { %v353_v51 = vrot.slane %v351_v40, 5  ;;  %v359_v54 = vrot.slane %v357_v41, 5  ;;  %v361_v55 = vshrl.u32 %v4180_v24, 16  ;;  %v367_v58 = vshll.u32 %v4197_v8, 16 }
  0x30   : > { %5013 = vst [vmem:[#allocation6_spill] sm:$0xff] %v4204_v43  ;;  %3379 = vmatprep.mubr.msk.bf16.mxu1 %vm637_vm3, %v4204_v43  ;;  %v341_v56 = vrot.slane %v340_v44, 4  ;;  %v372_v59 = vshrl.u32 %v4202_v42, 16  ;;  %v375_v60 = vshll.u32 %v4202_v42, 16  ;;  %3512 = vmatmul.mubr.msk.bf16.gmra.mrb[4].mxu0 %vm637_vm3, %v4204_v43  ;;  %v336_v61 = vsel %vm4079_vm4, %v331_v50, %v335_v29 }
  0x31   : > { %v354_v63 = vor.u32 %v353_v51, %v350_v49  ;;  %v363_v0 = vrot.slane %v361_v55, 4  ;;  %v381_v12 = vshll.u32 %v4207_v6, 16  ;;  %v369_v21 = vrot.slane %v367_v58, 5 }
  0x32   : > { %v346_v17 = vsel %vm4079_vm4, %v341_v56, %v345_v47  ;;  %v374_v22 = vrot.slane %v372_v59, 4  ;;  %v377_v26 = vrot.slane %v375_v60, 5  ;;  %v385_v36 = vshrl.u32 %v4207_v6, 16  ;;  %v4243_v47 = vld [vmem:[%s4032_s22 + $0x68] sm:$0x1] }
  0x33   : > { %v4231_v7 = vcombine.low %v336_v61, %v346_v17  ;;  %v355_v29 = vrot.slane %v354_v63, 4  ;;  %v364_v30 = vor.u32 %v363_v0, %v359_v54  ;;  %v383_v31 = vrot.slane %v381_v12, 5 }
  0x34   : > { %v378_v35 = vor.u32 %v377_v26, %v374_v22  ;;  %v391_v37 = vshll.u32 %v4220_v11, 16  ;;  %v396_v40 = vshrl.u32 %v4224_v15, 16  ;;  %v399_v49 = vshll.u32 %v4224_v15, 16 }
  0x35   : > { %5014 = vst [vmem:[#allocation7_spill] sm:$0xff] %v4231_v7  ;;  %3515 = vmatprep.mubr.msk.bf16.mxu0 %vm637_vm3, %v4231_v7  ;;  %3380 = vmatmul.mubr.msk.bf16.gmra.mrb[8].mxu1 %vm637_vm3, %v4231_v7  ;;  %v360_v41 = vsel %vm4079_vm4, %v355_v29, %v359_v54  ;;  %v365_v44 = vrot.slane %v364_v30, 4  ;;  %v405_v50 = vshll.u32 %v4229_v27, 16  ;;  %v387_v55 = vrot.slane %v385_v36, 4  ;;  %v4251_v54 = vld [vmem:[%s4032_s22 + $0x6c] sm:$0xf] }
  0x36   : > { %v379_v51 = vrot.slane %v378_v35, 4  ;;  %v393_v56 = vrot.slane %v391_v37, 5  ;;  %v398_v58 = vrot.slane %v396_v40, 4  ;;  %v401_v60 = vrot.slane %v399_v49, 5  ;;  %v4267_v36 = vld [vmem:[%s4032_s22 + $0x70] sm:$0xf] }
  0x37   : > { %v370_v59 = vsel %vm4079_vm4, %v365_v44, %v369_v21  ;;  %v407_v61 = vrot.slane %v405_v50, 5  ;;  %v409_v63 = vshrl.u32 %v4229_v27, 16  ;;  %v388_v17 = vor.u32 %v387_v55, %v383_v31  ;;  %v4418_v7 = vld [vmem:[%s4032_s22 + $0xa0] sm:$0xf] }
  0x38   : > { %v4253_v0 = vcombine.low %v360_v41, %v370_v59  ;;  %v384_v12 = vsel %vm4079_vm4, %v379_v51, %v383_v31  ;;  %v415_v22 = vshll.u32 %v4243_v47, 16  ;;  %v402_v21 = vor.u32 %v401_v60, %v398_v58  ;;  %v4280_v51 = vld [vmem:[%s4032_s22 + $0x74] sm:$0x1] }
  0x39   : > { %v411_v29 = vrot.slane %v409_v63, 4  ;;  %v3055_v30 = vrot.slane %v4057_v16, 9  ;;  %v1171_v35 = vrot.slane %v4060_v18, 5  ;;  %v389_v31 = vrot.slane %v388_v17, 4 }
  0x3a   : > { %5015 = vst [vmem:[#allocation8_spill] sm:$0xff] %v4253_v0  ;;  %3516 = vmatmul.mubr.msk.bf16.gmra.mrb[8].mxu0 %vm637_vm3, %v4253_v0  ;;  %3383 = vmatprep.mubr.msk.bf16.mxu1 %vm637_vm3, %v4253_v0  ;;  %v417_v37 = vrot.slane %v415_v22, 5  ;;  %v420_v40 = vshrl.u32 %v4251_v54, 16  ;;  %v423_v41 = vshll.u32 %v4251_v54, 16  ;;  %v403_v44 = vrot.slane %v402_v21, 4 }
  0x3b   : > { %v412_v49 = vor.u32 %v411_v29, %v407_v61  ;;  %v1172_v16 = vsel %vm4260_vm7, %v3055_v30, %v1171_v35  ;;  %v1173_v18 = vrot.slane %v1171_v35, 4  ;;  %v394_v50 = vsel %vm4079_vm4, %v389_v31, %v393_v56  ;;  %v4292_v56 = vld [vmem:[%s4032_s22 + $0x78] sm:$0xf]  ;;  %v4308_v31 = vld [vmem:[%s4032_s22 + $0x7c] sm:$0xf] }
  0x3c   : > { %v422_v55 = vrot.slane %v420_v40, 4  ;;  %v425_v58 = vrot.slane %v423_v41, 5  ;;  %v429_v59 = vshll.u32 %v4267_v36, 16  ;;  %v4283_v60 = vcombine.low %v384_v12, %v394_v50 }
  0x3d   : > { %v408_v63 = vsel %vm4079_vm4, %v403_v44, %v407_v61  ;;  %v413_v17 = vrot.slane %v412_v49, 4  ;;  %v1175_v22 = vsel %vm4260_vm7, %v1173_v18, %v1174_v45  ;;  %v433_v35 = vshrl.u32 %v4267_v36, 16  ;;  %v4313_v49 = vld [vmem:[%s4032_s22 + $0x80] sm:$0x1] }
  0x3e   : > { %5018 = vst [vmem:[#allocation9_spill] sm:$0xff] %v4283_v60  ;;  %v4294_v21 = vcombine.low %v1172_v16, %v1175_v22  ;;  %v426_v29 = vor.u32 %v425_v58, %v422_v55  ;;  %v431_v30 = vrot.slane %v429_v59, 5  ;;  %3519 = vmatprep.mubr.msk.bf16.mxu0 %vm637_vm3, %v4283_v60  ;;  %3384 = vmatmul.mubr.msk.bf16.gmra.mrb[12].mxu1 %vm637_vm3, %v4283_v60  ;;  %v439_v45 = vshll.u32 %v4280_v51, 16  ;;  %v4411_v60 = vld [vmem:[%s4032_s22 + $0x9c] sm:$0xf] }
  0x3f   : > { %v418_v19 = vsel %vm4079_vm4, %v413_v17, %v417_v37  ;;  %v3056_v61 = vrot.slane %v4075_v33, 9  ;;  %v1180_v12 = vrot.slane %v1178_v1, 4  ;;  %v435_v44 = vrot.slane %v433_v35, 4 }
  0x40   : > { %5019 = vst [vmem:[#allocation10_spill] sm:$0xff] %v4294_v21  ;;  %v4310_v40 = vcombine.low %v408_v63, %v418_v19  ;;  %v427_v41 = vrot.slane %v426_v29, 4  ;;  %v444_v16 = vshrl.u32 %v4292_v56, 16  ;;  %v441_v18 = vrot.slane %v439_v45, 5  ;;  %v4339_v29 = vld [vmem:[%s4032_s22 + $0x84] sm:$0xf] }
  0x41   : > { %v1179_v37 = vsel %vm4260_vm7, %v3056_v61, %v1178_v1  ;;  %v1182_v50 = vsel %vm4260_vm7, %v1180_v12, %v1181_v2  ;;  %v447_v55 = vshll.u32 %v4292_v56, 16  ;;  %v436_v59 = vor.u32 %v435_v44, %v431_v30 }
  0x42   : > { %5020 = vst [vmem:[#allocation11_spill] sm:$0xff] %v4310_v40  ;;  %3520 = vmatmul.mubr.msk.bf16.gmra.mrb[12].mxu0 %vm637_vm3, %v4310_v40  ;;  %3387 = vmatprep.mubr.msk.bf16.mxu1 %vm637_vm3, %v4310_v40  ;;  %v432_v58 = vsel %vm4079_vm4, %v427_v41, %v431_v30  ;;  %v4331_v63 = vcombine.low %v1179_v37, %v1182_v50  ;;  %v446_v1 = vrot.slane %v444_v16, 4  ;;  %v453_v2 = vshll.u32 %v4308_v31, 16  ;;  %v4345_v16 = vld [vmem:[%s4032_s22 + $0x88] sm:$0xf] }
  0x43   : > { %3541 = vmatprep.mubr.msk.bf16.mxu0 %vm637_vm3, %v4294_v21  ;;  %v449_v46 = vrot.slane %v447_v55, 5  ;;  %v457_v17 = vshrl.u32 %v4308_v31, 16  ;;  %v463_v22 = vshll.u32 %v4313_v49, 16  ;;  %v437_v35 = vrot.slane %v436_v59, 4 }
  0x44   : > { %5021 = vst [vmem:[#allocation12_spill] sm:$0xff] %v4331_v63  ;;  %v3057_v30 = vrot.slane %v4102_v57, 9  ;;  %v1185_v19 = vrot.slane %v4107_v62, 5  ;;  %v1188_v45 = vrot.slane %v4115_v4, 5  ;;  %v455_v12 = vrot.slane %v453_v2, 5 }
  0x45   : > { %v450_v61 = vor.u32 %v449_v46, %v446_v1  ;;  %v459_v41 = vrot.slane %v457_v17, 4  ;;  %v465_v44 = vrot.slane %v463_v22, 5  ;;  %v442_v37 = vsel %vm4079_vm4, %v437_v35, %v441_v18  ;;  %v4355_v1 = vld [vmem:[%s4032_s22 + $0x8c] sm:$0x1] }
  0x46   : > { %v1186_v50 = vsel %vm4260_vm7, %v3057_v30, %v1185_v19  ;;  %v1187_v55 = vrot.slane %v1185_v19, 4  ;;  %v468_v59 = vshrl.u32 %v4339_v29, 16  ;;  %v4352_v3 = vcombine.low %v432_v58, %v442_v37 }
  0x47   : > { %v451_v40 = vrot.slane %v450_v61, 4  ;;  %v460_v4 = vor.u32 %v459_v41, %v455_v12  ;;  %v471_v46 = vshll.u32 %v4339_v29, 16  ;;  %v477_v18 = vshll.u32 %v4345_v16, 16  ;;  %v4369_v61 = vld [vmem:[%s4032_s22 + $0x90] sm:$0xf] }
  0x48   : > { %5022 = vst [vmem:[#allocation13_spill] sm:$0xff] %v4352_v3  ;;  %v1189_v2 = vsel %vm4260_vm7, %v1187_v55, %v1188_v45  ;;  %v470_v17 = vrot.slane %v468_v59, 4  ;;  %v481_v22 = vshrl.u32 %v4345_v16, 16  ;;  %3388 = vmatmul.mubr.msk.bf16.gmra.mrb[16].mxu1 %vm637_vm3, %v4352_v3  ;;  %v4374_v45 = vld [vmem:[%s4974_s1 + $0xe] sm:$0x3]  ;;  %v1192_v59 = vrot.slane %v4133_v28, 5 }
  0x49   : > { %v456_v58 = vsel %vm4079_vm4, %v451_v40, %v455_v12  ;;  %v461_v35 = vrot.slane %v460_v4, 4  ;;  %v4366_v30 = vcombine.low %v1186_v50, %v1189_v2  ;;  %v473_v19 = vrot.slane %v471_v46, 5  ;;  %5024 = vst [vmem:[#allocation15_spill] sm:$0xff] %v4374_v45  ;;  %v4388_v46 = vld [vmem:[%s4032_s22 + $0x94] sm:$0xf] }
  0x4a   : > { %3542 = vmatmul.mubr.msk.bf16.vlgmr.msra.gmra.mrb[0].mxu0 %vm637_vm3, %v4331_v63  ;;  %v479_v41 = vrot.slane %v477_v18, 5  ;;  %v483_v37 = vrot.slane %v481_v22, 4  ;;  %v487_v40 = vshll.u32 %v4355_v1, 16  ;;  %v3058_v12 = vrot.slane %v4121_v14, 9  ;;  %v4393_v3 = vld [vmem:[%s4032_s22 + $0x98] sm:$0x1] }
  0x4b   : > { %5023 = vst [vmem:[#allocation14_spill] sm:$0xff] %v4366_v30  ;;  %3574 = vmatpush3.bf16.msra.mxu0 %v4067_v20  ;;  %v466_v50 = vsel %vm4079_vm4, %v461_v35, %v465_v44  ;;  %3545 = vmatprep.mubr.msk.bf16.mxu0 %vm637_vm3, %v4366_v30  ;;  %v474_v55 = vor.u32 %v473_v19, %v470_v17  ;;  %v1195_v4 = vrot.slane %v4140_v32, 5  ;;  %v492_v20 = vshrl.u32 %v4369_v61, 16 }
  0x4c   : > { %v4390_v2 = vcombine.low %v456_v58, %v466_v50  ;;  %v484_v18 = vor.u32 %v483_v37, %v479_v41  ;;  %v489_v22 = vrot.slane %v487_v40, 5  ;;  %3941 = vmatprep.subr.msk.bf16.mxu0 %vm686_vm0, %v4374_v45  ;;  %v1193_v17 = vsel %vm4260_vm7, %v3058_v12, %v1192_v59 }
  0x4d   : > { %v475_v44 = vrot.slane %v474_v55, 4  ;;  %v1194_v35 = vrot.slane %v1192_v59, 4  ;;  %v495_v32 = vshll.u32 %v4369_v61, 16  ;;  %v494_v19 = vrot.slane %v492_v20, 4 }
  0x4e   : > { %5025 = vst [vmem:[#allocation16_spill] sm:$0xff] %v4390_v2  ;;  %3391 = vmatprep.mubr.msk.bf16.mxu1 %vm637_vm3, %v4390_v2  ;;  %v485_v58 = vrot.slane %v484_v18, 4  ;;  %v501_v37 = vshll.u32 %v4388_v46, 16  ;;  %v505_v40 = vshrl.u32 %v4388_v46, 16  ;;  %v511_v59 = vshll.u32 %v4393_v3, 16 }
  0x4f   : > { %v480_v50 = vsel %vm4079_vm4, %v475_v44, %v479_v41  ;;  %v1196_v55 = vsel %vm4260_vm7, %v1194_v35, %v1195_v4  ;;  %v497_v12 = vrot.slane %v495_v32, 5  ;;  %v3059_v4 = vrot.slane %v4148_v48, 9 }
  0x50   : > { %v490_v2 = vsel %vm4079_vm4, %v485_v58, %v489_v22  ;;  %v4415_v18 = vcombine.low %v1193_v17, %v1196_v55  ;;  %v503_v20 = vrot.slane %v501_v37, 5  ;;  %v507_v0 = vrot.slane %v505_v40, 4  ;;  %v4431_v58 = vld [vmem:[%s4032_s22 + $0xa4] sm:$0x1] }
  0x51   : > { %v4420_v43 = vcombine.low %v480_v50, %v490_v2  ;;  %v498_v41 = vor.u32 %v497_v12, %v494_v19  ;;  %v513_v44 = vrot.slane %v511_v59, 5  ;;  %v1199_v32 = vrot.slane %v4156_v52, 5 }
  0x52   : > { %5026 = vst [vmem:[#allocation17_spill] sm:$0xff] %v4415_v18  ;;  %3546 = vmatmul.mubr.msk.bf16.gmra.mrb[4].mxu0 %vm637_vm3, %v4415_v18  ;;  %v508_v35 = vor.u32 %v507_v0, %v503_v20  ;;  %v1202_v22 = vrot.slane %v4168_v5, 5  ;;  %v516_v17 = vshrl.u32 %v4411_v60, 16  ;;  %v519_v19 = vshll.u32 %v4411_v60, 16 }
  0x53   : > { %5027 = vst [vmem:[#allocation18_spill] sm:$0xff] %v4420_v43  ;;  %3392 = vmatmul.mubr.msk.bf16.gmra.mrb[20].mxu1 %vm637_vm3, %v4420_v43  ;;  %v499_v2 = vrot.slane %v498_v41, 4  ;;  %v525_v37 = vshll.u32 %v4418_v7, 16  ;;  %v529_v0 = vshrl.u32 %v4418_v7, 16  ;;  %v1200_v5 = vsel %vm4260_vm7, %v3059_v4, %v1199_v32 }
  0x54   : > { %v509_v40 = vrot.slane %v508_v35, 4  ;;  %v1201_v50 = vrot.slane %v1199_v32, 4  ;;  %v518_v55 = vrot.slane %v516_v17, 4  ;;  %v521_v59 = vrot.slane %v519_v19, 5  ;;  %v4450_v32 = vld [vmem:[%s4032_s22 + $0xac] sm:$0xf] }
  0x55   : > { %v504_v12 = vsel %vm4079_vm4, %v499_v2, %v503_v20  ;;  %v527_v41 = vrot.slane %v525_v37, 5  ;;  %v531_v43 = vrot.slane %v529_v0, 4  ;;  %v535_v35 = vshll.u32 %v4431_v58, 16 }
  0x56   : > { %v514_v53 = vsel %vm4079_vm4, %v509_v40, %v513_v44  ;;  %v1203_v18 = vsel %vm4260_vm7, %v1201_v50, %v1202_v22  ;;  %v3060_v4 = vrot.slane %v4173_v13, 9  ;;  %v522_v2 = vor.u32 %v521_v59, %v518_v55 }
  0x57   : > { %v4452_v17 = vcombine.low %v504_v12, %v514_v53  ;;  %v4454_v20 = vcombine.low %v1200_v5, %v1203_v18  ;;  %v532_v19 = vor.u32 %v531_v43, %v527_v41  ;;  %v537_v37 = vrot.slane %v535_v35, 5  ;;  %v4464_v18 = vld [vmem:[%s4032_s22 + $0xb0] sm:$0x1] }
  0x58   : > { %v1206_v0 = vrot.slane %v4180_v24, 5  ;;  %v1209_v44 = vrot.slane %v4197_v8, 5  ;;  %v540_v22 = vshrl.u32 %v4441_v25, 16  ;;  %v523_v53 = vrot.slane %v522_v2, 4 }
  0x59   : > { %5028 = vst [vmem:[#allocation19_spill] sm:$0xff] %v4452_v17  ;;  %5029 = vst [vmem:[#allocation20_spill] sm:$0xff] %v4454_v20  ;;  %3395 = vmatprep.mubr.msk.bf16.mxu1 %vm637_vm3, %v4452_v17  ;;  %3549 = vmatprep.mubr.msk.bf16.mxu0 %vm637_vm3, %v4454_v20  ;;  %v533_v40 = vrot.slane %v532_v19, 4  ;;  %v543_v43 = vshll.u32 %v4441_v25, 16  ;;  %v549_v5 = vshll.u32 %v4450_v32, 16  ;;  %v553_v12 = vshrl.u32 %v4450_v32, 16 }
  0x5a   : > { %v1207_v8 = vsel %vm4260_vm7, %v3060_v4, %v1206_v0  ;;  %v1208_v50 = vrot.slane %v1206_v0, 4  ;;  %v542_v55 = vrot.slane %v540_v22, 4  ;;  %v528_v59 = vsel %vm4079_vm4, %v523_v53, %v527_v41  ;;  %v4476_v17 = vld [vmem:[%s4032_s22 + $0xb4] sm:$0xf]  ;;  %v4488_v53 = vld [vmem:[%s4032_s22 + $0xb8] sm:$0xf] }
  0x5b   : > { %v538_v35 = vsel %vm4079_vm4, %v533_v40, %v537_v37  ;;  %v545_v2 = vrot.slane %v543_v43, 5  ;;  %v551_v19 = vrot.slane %v549_v5, 5  ;;  %v555_v0 = vrot.slane %v553_v12, 4 }
  0x5c   : > { %v4478_v20 = vcombine.low %v528_v59, %v538_v35  ;;  %v1210_v4 = vsel %vm4260_vm7, %v1208_v50, %v1209_v44  ;;  %v559_v22 = vshll.u32 %v4464_v18, 16  ;;  %v3061_v41 = vrot.slane %v4202_v42, 9  ;;  %v4494_v44 = vld [vmem:[%s4032_s22 + $0xbc] sm:$0x1] }
  0x5d   : > { %v4483_v30 = vcombine.low %v1207_v8, %v1210_v4  ;;  %v546_v63 = vor.u32 %v545_v2, %v542_v55  ;;  %v1213_v37 = vrot.slane %v4207_v6, 5  ;;  %v556_v40 = vor.u32 %v555_v0, %v551_v19 }
  0x5e   : > { %5030 = vst [vmem:[#allocation21_spill] sm:$0xff] %v4478_v20  ;;  %3396 = vmatmul.mubr.msk.bf16.gmra.mrb[24].mxu1 %vm637_vm3, %v4478_v20  ;;  %v561_v43 = vrot.slane %v559_v22, 5  ;;  %v1216_v5 = vrot.slane %v4220_v11, 5  ;;  %v564_v50 = vshrl.u32 %v4476_v17, 16  ;;  %v567_v59 = vshll.u32 %v4476_v17, 16 }
  0x5f   : > { %5031 = vst [vmem:[#allocation22_spill] sm:$0xff] %v4483_v30  ;;  %3550 = vmatmul.mubr.msk.bf16.gmra.mrb[8].mxu0 %vm637_vm3, %v4483_v30  ;;  %v547_v8 = vrot.slane %v546_v63, 4  ;;  %v1214_v55 = vsel %vm4260_vm7, %v3061_v41, %v1213_v37  ;;  %v1215_v12 = vrot.slane %v1213_v37, 4  ;;  %v557_v35 = vrot.slane %v556_v40, 4 }
  0x60   : > { %v566_v2 = vrot.slane %v564_v50, 4  ;;  %v573_v4 = vshll.u32 %v4488_v53, 16  ;;  %v577_v11 = vshrl.u32 %v4488_v53, 16  ;;  %v569_v20 = vrot.slane %v567_v59, 5 }
  0x61   : > { %v552_v0 = vsel %vm4079_vm4, %v547_v8, %v551_v19  ;;  %v1217_v22 = vsel %vm4260_vm7, %v1215_v12, %v1216_v5  ;;  %v583_v63 = vshll.u32 %v4494_v44, 16  ;;  %v562_v41 = vsel %vm4079_vm4, %v557_v35, %v561_v43 }
  0x62   : > { %v4511_v37 = vcombine.low %v1214_v55, %v1217_v22  ;;  %v575_v40 = vrot.slane %v573_v4, 5  ;;  %v579_v50 = vrot.slane %v577_v11, 4  ;;  %v4513_v30 = vcombine.low %v552_v0, %v562_v41 }
  0x63   : > { %v570_v21 = vor.u32 %v569_v20, %v566_v2  ;;  %v585_v45 = vrot.slane %v583_v63, 5  ;;  %v3062_v42 = vrot.slane %v4224_v15, 9  ;;  %v1220_v5 = vrot.slane %v4229_v27, 5 }
  0x64   : > { %3553 = vmatprep.mubr.msk.bf16.mxu0 %vm637_vm3, %v4511_v37  ;;  %v580_v19 = vor.u32 %v579_v50, %v575_v40  ;;  %v1223_v8 = vrot.slane %v4243_v47, 5  ;;  %v3063_v43 = vrot.slane %v4251_v54, 9  ;;  %3399 = vmatprep.mubr.msk.bf16.mxu1 %vm637_vm3, %v4513_v30  ;;  %v3022_v20 = vcombine.low %v4046_v9, %v4049_v10 }
  0x65   : > { %v571_v55 = vrot.slane %v570_v21, 4  ;;  %v1227_v12 = vrot.slane %v4267_v36, 5  ;;  %v1230_v59 = vrot.slane %v4280_v51, 5  ;;  %v1221_v2 = vsel %vm4260_vm7, %v3062_v42, %v1220_v5 }
  0x66   : > { %v581_v35 = vrot.slane %v580_v19, 4  ;;  %v1222_v4 = vrot.slane %v1220_v5, 4  ;;  %v1234_v47 = vrot.slane %v4308_v31, 5  ;;  %v3064_v9 = vrot.slane %v4292_v56, 9 }
  0x67   : > { %v576_v11 = vsel %vm4079_vm4, %v571_v55, %v575_v40  ;;  %v1228_v21 = vsel %vm4260_vm7, %v3063_v43, %v1227_v12  ;;  %v1229_v0 = vrot.slane %v1227_v12, 4  ;;  %v1237_v42 = vrot.slane %v4313_v49, 5 }
  0x68   : > { %v586_v10 = vsel %vm4079_vm4, %v581_v35, %v585_v45  ;;  %v1224_v51 = vsel %vm4260_vm7, %v1222_v4, %v1223_v8  ;;  %v1236_v22 = vrot.slane %v1234_v47, 4  ;;  %v3065_v19 = vrot.slane %v4339_v29, 9 }
  0x69   : > { %v4540_v63 = vcombine.low %v576_v11, %v586_v10  ;;  %v4542_v41 = vcombine.low %v1221_v2, %v1224_v51  ;;  %v1231_v40 = vsel %vm4260_vm7, %v1229_v0, %v1230_v59  ;;  %v1241_v5 = vrot.slane %v4345_v16, 5 }
  0x6a   : > { %v4546_v50 = vcombine.low %v1228_v21, %v1231_v40  ;;  %v1244_v49 = vrot.slane %v4355_v1, 5  ;;  %v1235_v45 = vsel %vm4260_vm7, %v3064_v9, %v1234_v47  ;;  %v1238_v8 = vsel %vm4260_vm7, %v1236_v22, %v1237_v42 }
  0x6b   : > { %3400 = vmatmul.mubr.msk.bf16.gmra.mrb[28].mxu1 %vm637_vm3, %v4540_v63  ;;  %3554 = vmatmul.mubr.msk.bf16.gmra.mrb[12].mxu0 %vm637_vm3, %v4542_v41  ;;  %v1243_v43 = vrot.slane %v1241_v5, 4  ;;  %v1248_v55 = vrot.slane %v4388_v46, 5  ;;  %v1255_v12 = vrot.slane %v4418_v7, 5  ;;  %v1242_v59 = vsel %vm4260_vm7, %v3065_v19, %v1241_v5 }
  0x6c   : > { %3405 = vmatprep.mubr.msk.bf16.mxu1 %vm637_vm3, %v3022_v20  ;;  %3557 = vmatprep.mubr.msk.bf16.mxu0 %vm637_vm3, %v4546_v50  ;;  %v4568_v20 = vcombine.low %v1235_v45, %v1238_v8  ;;  %v3066_v35 = vrot.slane %v4369_v61, 9  ;;  %v1251_v4 = vrot.slane %v4393_v3, 5  ;;  %v4574_v47 = vcombine.low %v4075_v33, %v4088_v39  ;;  %v4586_v3 = vld [vmem:[%s4974_s1 + $0x6] sm:$0x3] }
  0x6d   : > { %v1245_v1 = vsel %vm4260_vm7, %v1243_v43, %v1244_v49  ;;  %v1250_v2 = vrot.slane %v1248_v55, 4  ;;  %v3067_v11 = vrot.slane %v4411_v60, 9  ;;  %v1373_v21 = vsel %vm686_vm0, %v4128_v23, 0 }
  0x6e   : > { %v4579_v0 = vcombine.low %v1242_v59, %v1245_v1  ;;  %v1257_v9 = vrot.slane %v1255_v12, 4  ;;  %v1258_v10 = vrot.slane %v4431_v58, 5  ;;  %v1262_v51 = vrot.slane %v4450_v32, 5 }
  0x6f   : > { %v1249_v33 = vsel %vm4260_vm7, %v3066_v35, %v1248_v55  ;;  %v1252_v39 = vsel %vm4260_vm7, %v1250_v2, %v1251_v4  ;;  %v4600_v23 = vcombine.low %v4102_v57, %v4107_v62  ;;  %v1256_v58 = vsel %vm4260_vm7, %v3067_v11, %v1255_v12 }
  0x70   : > { %v4606_v22 = vcombine.low %v4224_v15, %v4229_v27  ;;  %v1259_v42 = vsel %vm4260_vm7, %v1257_v9, %v1258_v10  ;;  %v3068_v40 = vrot.slane %v4441_v25, 9  ;;  %v1269_v19 = vrot.slane %v4488_v53, 5 }
  0x71   : > { %v4616_v57 = vcombine.low %v4251_v54, %v4267_v36  ;;  %v4620_v62 = vcombine.low %v1249_v33, %v1252_v39  ;;  %v1264_v15 = vrot.slane %v1262_v51, 4  ;;  %v1265_v27 = vrot.slane %v4464_v18, 5  ;;  %v195_v18 = vld [vmem:[%s4032_s22 + $0xc8] sm:$0x1] }
  0x72   : > { %v4625_v5 = vcombine.low %v4292_v56, %v4308_v31  ;;  %v4629_v49 = vcombine.low %v4339_v29, %v4345_v16  ;;  %v4633_v54 = vcombine.low %v4369_v61, %v4388_v46  ;;  %v4637_v36 = vcombine.low %v4411_v60, %v4418_v7  ;;  %v4656_v61 = vld [vmem:[%s4032_s22 + $0xc4] sm:$0xf] }
  0x73   : > { %3406 = vmatmul.mubr.msk.bf16.vlgmr.msra.gmra.mrb[0].mxu1 %vm637_vm3, %v4085_v38  ;;  %3558 = vmatmul.mubr.msk.bf16.gmra.mrb[16].mxu0 %vm637_vm3, %v4568_v20  ;;  %v4641_v45 = vcombine.low %v4441_v25, %v4450_v32  ;;  %v4645_v56 = vcombine.low %v4121_v14, %v4133_v28  ;;  %v4647_v31 = vcombine.low %v1256_v58, %v1259_v42  ;;  %v3069_v16 = vrot.slane %v4476_v17, 9  ;;  %v5032_v42 = vld [vmem:[#allocation5_spill] sm:$0xff] }
  0x74   : > { %3438 = vmatpush3.bf16.msra.mxu1 %v1373_v21  ;;  %3409 = vmatprep.mubr.msk.bf16.mxu1 %vm637_vm3, %v4574_v47  ;;  %v4651_v29 = vcombine.low %v4476_v17, %v4488_v53  ;;  %v1271_v7 = vrot.slane %v1269_v19, 4  ;;  %v1272_v60 = vrot.slane %v4494_v44, 5  ;;  %v1263_v14 = vsel %vm4260_vm7, %v3068_v40, %v1262_v51  ;;  %v4676_v17 = vld [vmem:[%s4032_s22 + $0xc0] sm:$0xf] }
  0x75   : > { %3561 = vmatprep.mubr.msk.bf16.mxu0 %vm637_vm3, %v4579_v0  ;;  %3936 = vmatprep.subr.msk.bf16.mxu1 %vm686_vm0, %v4586_v3  ;;  %v1266_v28 = vsel %vm4260_vm7, %v1264_v15, %v1265_v27  ;;  %v2005_v25 = vrot.slane %v4656_v61, 5  ;;  %v1270_v46 = vsel %vm4260_vm7, %v3069_v16, %v1269_v19  ;;  %v4681_v53 = vcombine.low %v4148_v48, %v4156_v52 }
  0x76   : > { %v1273_v32 = vsel %vm4260_vm7, %v1271_v7, %v1272_v60  ;;  %v4683_v44 = vcombine.low %v1263_v14, %v1266_v28  ;;  %v4687_v8 = vcombine.low %v4173_v13, %v4180_v24  ;;  %v1775_v43 = vshrl.u32 %v4676_v17, 16  ;;  %v3195_v60 = vld [vmem:[%s4974_s1 + $0x10] sm:$0x3]  ;;  %v3970_v14 = vld [vmem:[%s4032_s22 + $0x4] sm:$0xf] }
  0x77   : > { %v1778_v55 = vshll.u32 %v4676_v17, 16  ;;  %v1784_v12 = vshll.u32 %v4656_v61, 16  ;;  %v1788_v59 = vshrl.u32 %v4656_v61, 16  ;;  %v4693_v1 = vcombine.low %v1270_v46, %v1273_v32  ;;  %v3972_v32 = vld [vmem:[%s4032_s22] sm:$0xf] }
  0x78   : > { %v3139_v35 = vrot.slane %v4676_v17, 9  ;;  %v2007_v48 = vrot.slane %v2005_v25, 4  ;;  %v2008_v52 = vrot.slane %v195_v18, 5  ;;  %v1777_v2 = vrot.slane %v1775_v43, 4 }
  0x79   : > { %v1780_v4 = vrot.slane %v1778_v55, 5  ;;  %v1786_v11 = vrot.slane %v1784_v12, 5  ;;  %v1790_v21 = vrot.slane %v1788_v59, 4  ;;  %v1794_v9 = vshll.u32 %v195_v18, 16 }
  0x7a   : > { %v2006_v10 = vsel %vm4260_vm7, %v3139_v35, %v2005_v25  ;;  %v2009_v51 = vsel %vm4260_vm7, %v2007_v48, %v2008_v52  ;;  %v4710_v40 = vcombine.low %v5032_v42, %v4207_v6  ;;  %v5033_v6 = vld [vmem:[#allocation15_spill] sm:$0xff]  ;;  %v1164_v28 = vrot.slane %v3970_v14, 5  ;;  %v5034_v48 = vld [vmem:[#allocation10_spill] sm:$0xff]  ;;  %v5035_v52 = vld [vmem:[#allocation12_spill] sm:$0xff] }
  0x7b   : > { %3410 = vmatmul.mubr.msk.bf16.gmra.mrb[4].mxu1 %vm637_vm3, %v4600_v23  ;;  %3562 = vmatmul.mubr.msk.bf16.gmra.mrb[20].mxu0 %vm637_vm3, %v4620_v62  ;;  %v1781_v13 = vor.u32 %v1780_v4, %v1777_v2  ;;  %v1791_v24 = vor.u32 %v1790_v21, %v1786_v11  ;;  %v1796_v58 = vrot.slane %v1794_v9, 5  ;;  %v4712_v19 = vcombine.low %v2006_v10, %v2009_v51  ;;  %v3971_v25 = vld [vmem:[%s4032_s22 + $0x8] sm:$0x1]  ;;  %v5037_v4 = vld [vmem:[#allocation17_spill] sm:$0xff]  ;;  %v5038_v21 = vld [vmem:[#allocation20_spill] sm:$0xff] }
  0x7c   : > { %3413 = vmatprep.mubr.msk.bf16.mxu1 %vm637_vm3, %v4645_v56  ;;  %3565 = vmatprep.mubr.msk.bf16.mxu0 %vm637_vm3, %v4647_v31  ;;  %v2453_v7 = vsel %vm686_vm0, %v5033_v6, 0  ;;  %v1167_v46 = vrot.slane %v3971_v25, 5  ;;  %v3054_v18 = vrot.slane %v3972_v32, 9  ;;  %v1166_v43 = vrot.slane %v1164_v28, 4  ;;  %v3973_v2 = vld [vmem:[%s4974_s1 + $0x8] sm:$0x3] }
  0x7d   : > { %v1782_v33 = vrot.slane %v1781_v13, 4  ;;  %v1792_v39 = vrot.slane %v1791_v24, 4  ;;  %v1579_v35 = vsel %vm686_vm0, %v4586_v3, 0  ;;  %v5036_v3 = vld [vmem:[#allocation14_spill] sm:$0xff]  ;;  %v4807_v24 = vld [vmem:[%s4032_s22 + $0xcc] sm:$0xf] }
  0x7e   : > { %v1165_v55 = vsel %vm4260_vm7, %v3054_v18, %v1164_v28  ;;  %v1168_v12 = vsel %vm4260_vm7, %v1166_v43, %v1167_v46  ;;  %v5039_v13 = vld [vmem:[#allocation22_spill] sm:$0xff]  ;;  %v4810_v9 = vld [vmem:[%s4032_s22 + $0xd0] sm:$0xf]  ;;  %v2665_v10 = vsel %vm686_vm0, %v3195_v60, 0  ;;  %v5045_v42 = vld [vmem:[#allocation9_spill] sm:$0xff]  ;;  %v2424_v14 = vshll.u32 %v4807_v24, 16 }
  0x7f   : > { %v1787_v15 = vsel %vm4079_vm4, %v1782_v33, %v1786_v11  ;;  %v1797_v27 = vsel %vm4079_vm4, %v1792_v39, %v1796_v58  ;;  %v3071_v59 = vcombine.low %v1165_v55, %v1168_v12  ;;  %v4796_v11 = vcombine.low %v4676_v17, %v4656_v61  ;;  %v5040_v17 = vld [vmem:[#allocation3_spill] sm:$0xff]  ;;  %v5041_v51 = vld [vmem:[#allocation4_spill] sm:$0xff]  ;;  %v5042_v33 = vld [vmem:[#allocation6_spill] sm:$0xff] }
  0x80   : > { %v4718_v16 = vcombine.low %v1787_v15, %v1797_v27  ;;  %v3159_v61 = vcombine.low %v4807_v24, %v4810_v9  ;;  %v5043_v39 = vld [vmem:[#allocation7_spill] sm:$0xff]  ;;  %v5044_v58 = vld [vmem:[#allocation8_spill] sm:$0xff]  ;;  %v5047_v27 = vld [vmem:[#allocation13_spill] sm:$0xff]  ;;  %v2434_v28 = vshrl.u32 %v4810_v9, 16  ;;  %v2426_v32 = vrot.slane %v2424_v14, 5 }
  0x81   : > { %v5046_v15 = vld [vmem:[#allocation11_spill] sm:$0xff]  ;;  %v5048_v6 = vld [vmem:[#allocation16_spill] sm:$0xff]  ;;  %v5050_v25 = vld [vmem:[#allocation2_spill] sm:$0xff]  ;;  %v2651_v34 = vrot.slane %v4810_v9, 5 }
  0x82   : > { %v5051_v46 = vld [vmem:[#allocation19_spill] sm:$0xff]  ;;  %v2436_v43 = vrot.slane %v2434_v28, 4  ;;  %v198_v55 = vld [vmem:[%s4032_s22 + $0xd4] sm:$0x1]  ;;  %v5052_v12 = vld [vmem:[#allocation21_spill] sm:$0xff] }
  0x83   : > { %3414 = vmatmul.mubr.msk.bf16.gmra.mrb[8].mxu1 %vm637_vm3, %v4681_v53  ;;  %3566 = vmatmul.mubr.msk.bf16.gmra.mrb[24].mxu0 %vm637_vm3, %v4683_v44 }
  0x84   : > { %3417 = vmatprep.mubr.msk.bf16.mxu1 %vm637_vm3, %v4687_v8  ;;  %3569 = vmatprep.mubr.msk.bf16.mxu0 %vm637_vm3, %v4693_v1 }
  0x8b   : > { %3418 = vmatmul.mubr.msk.bf16.gmra.mrb[12].mxu1 %vm637_vm3, %v4710_v40  ;;  %3570 = vmatmul.mubr.msk.bf16.gmra.mrb[28].mxu0 %vm637_vm3, %v4712_v19 }
  0x8c   : > { %3421 = vmatprep.mubr.msk.bf16.mxu1 %vm637_vm3, %v4606_v22  ;;  %3575 = vmatprep.mubr.msk.bf16.mxu0 %vm637_vm3, %v4574_v47 }
  0x93   : > { %3422 = vmatmul.mubr.msk.bf16.gmra.mrb[16].mxu1 %vm637_vm3, %v4616_v57  ;;  %3576 = vmatmul.mubr.msk.bf16.vlgmr.msra.gmra.mrb[0].mxu0 %vm637_vm3, %v4600_v23 }
  0x94   : > { %3608 = vmatpush3.bf16.msra.mxu0 %v2453_v7  ;;  %3425 = vmatprep.mubr.msk.bf16.mxu1 %vm637_vm3, %v4625_v5  ;;  %v5049_v7 = vld [vmem:[#allocation18_spill] sm:$0xff] }
  0x95   : > { %3579 = vmatprep.mubr.msk.bf16.mxu0 %vm637_vm3, %v4645_v56  ;;  %3942 = vmatprep.subr.msk.bf16.mxu0 %vm686_vm0, %v3195_v60  ;;  %v2421_v60 = vshrl.u32 %v4807_v24, 16 }
  0x9b   : > { %3426 = vmatmul.mubr.msk.bf16.gmra.mrb[20].mxu1 %vm637_vm3, %v4629_v49  ;;  %3580 = vmatmul.mubr.msk.bf16.gmra.mrb[4].mxu0 %vm637_vm3, %v4681_v53 }
  0x9c   : > { %3429 = vmatprep.mubr.msk.bf16.mxu1 %vm637_vm3, %v4633_v54  ;;  %3583 = vmatprep.mubr.msk.bf16.mxu0 %vm637_vm3, %v4687_v8 }
  0xa3   : > { %3430 = vmatmul.mubr.msk.bf16.gmra.mrb[24].mxu1 %vm637_vm3, %v4637_v36  ;;  %3584 = vmatmul.mubr.msk.bf16.gmra.mrb[8].mxu0 %vm637_vm3, %v4710_v40 }
  0xa4   : > { %3433 = vmatprep.mubr.msk.bf16.mxu1 %vm637_vm3, %v4641_v45  ;;  %3587 = vmatprep.mubr.msk.bf16.mxu0 %vm637_vm3, %v4606_v22 }
  0xab   : > { %3434 = vmatmul.mubr.msk.bf16.gmra.mrb[28].mxu1 %vm637_vm3, %v4651_v29  ;;  %3588 = vmatmul.mubr.msk.bf16.gmra.mrb[12].mxu0 %vm637_vm3, %v4616_v57 }
  0xac   : > { %3439 = vmatprep.mubr.msk.bf16.mxu1 %vm637_vm3, %v3071_v59  ;;  %3591 = vmatprep.mubr.msk.bf16.mxu0 %vm637_vm3, %v4625_v5 }
  0xb3   : > { %3440 = vmatmul.mubr.msk.bf16.vlgmr.msra.gmra.mrb[0].mxu1 %vm637_vm3, %v5034_v48  ;;  %3592 = vmatmul.mubr.msk.bf16.gmra.mrb[16].mxu0 %vm637_vm3, %v4629_v49 }
  0xb4   : > { %3472 = vmatpush3.bf16.msra.mxu1 %v1579_v35  ;;  %3443 = vmatprep.mubr.msk.bf16.mxu1 %vm637_vm3, %v5035_v52  ;;  %v2440_v35 = vshll.u32 %v198_v55, 16 }
  0xb5   : > { %3595 = vmatprep.mubr.msk.bf16.mxu0 %vm637_vm3, %v4633_v54  ;;  %3938 = vmatprep.subr.msk.bf16.mxu1 %vm686_vm0, %v3973_v2 }
  0xbb   : > { %3444 = vmatmul.mubr.msk.bf16.gmra.mrb[4].mxu1 %vm637_vm3, %v5036_v3  ;;  %3596 = vmatmul.mubr.msk.bf16.gmra.mrb[20].mxu0 %vm637_vm3, %v4637_v36 }
  0xbc   : > { %3447 = vmatprep.mubr.msk.bf16.mxu1 %vm637_vm3, %v5037_v4  ;;  %3599 = vmatprep.mubr.msk.bf16.mxu0 %vm637_vm3, %v4641_v45 }
  0xc3   : > { %3448 = vmatmul.mubr.msk.bf16.gmra.mrb[8].mxu1 %vm637_vm3, %v5038_v21  ;;  %3600 = vmatmul.mubr.msk.bf16.gmra.mrb[24].mxu0 %vm637_vm3, %v4651_v29 }
  0xc4   : > { %3451 = vmatprep.mubr.msk.bf16.mxu1 %vm637_vm3, %v5039_v13  ;;  %3603 = vmatprep.mubr.msk.bf16.mxu0 %vm637_vm3, %v4796_v11 }
  0xcb   : > { %3452 = vmatmul.mubr.msk.bf16.gmra.mrb[12].mxu1 %vm637_vm3, %v4511_v37  ;;  %3604 = vmatmul.mubr.msk.bf16.gmra.mrb[28].mxu0 %vm637_vm3, %v3159_v61  ;;  %v2442_v61 = vrot.slane %v2440_v35, 5 }
  0xcc   : > { %3455 = vmatprep.mubr.msk.bf16.mxu1 %vm637_vm3, %v4542_v41  ;;  %3609 = vmatprep.mubr.msk.bf16.mxu0 %vm637_vm3, %v5040_v17 }
  0xd3   : > { %3456 = vmatmul.mubr.msk.bf16.gmra.mrb[16].mxu1 %vm637_vm3, %v4546_v50  ;;  %3610 = vmatmul.mubr.msk.bf16.vlgmr.msra.gmra.mrb[0].mxu0 %vm637_vm3, %v5041_v51 }
  0xd4   : > { %3642 = vmatpush3.bf16.msra.mxu0 %v2665_v10  ;;  %3459 = vmatprep.mubr.msk.bf16.mxu1 %vm637_vm3, %v4568_v20 }
  0xd5   : > { %3613 = vmatprep.mubr.msk.bf16.mxu0 %vm637_vm3, %v5042_v33 }
  0xdb   : > { %3460 = vmatmul.mubr.msk.bf16.gmra.mrb[20].mxu1 %vm637_vm3, %v4579_v0  ;;  %3614 = vmatmul.mubr.msk.bf16.gmra.mrb[4].mxu0 %vm637_vm3, %v5043_v39 }
  0xdc   : > { %3463 = vmatprep.mubr.msk.bf16.mxu1 %vm637_vm3, %v4620_v62  ;;  %3617 = vmatprep.mubr.msk.bf16.mxu0 %vm637_vm3, %v5044_v58 }
  0xe3   : > { %3464 = vmatmul.mubr.msk.bf16.gmra.mrb[24].mxu1 %vm637_vm3, %v4647_v31  ;;  %3618 = vmatmul.mubr.msk.bf16.gmra.mrb[8].mxu0 %vm637_vm3, %v5045_v42 }
  0xe4   : > { %3467 = vmatprep.mubr.msk.bf16.mxu1 %vm637_vm3, %v4683_v44  ;;  %3621 = vmatprep.mubr.msk.bf16.mxu0 %vm637_vm3, %v5046_v15 }
  0xeb   : > { %3468 = vmatmul.mubr.msk.bf16.gmra.mrb[28].mxu1 %vm637_vm3, %v4693_v1  ;;  %3622 = vmatmul.mubr.msk.bf16.gmra.mrb[12].mxu0 %vm637_vm3, %v5047_v27 }
  0xec   : > { %3473 = vmatprep.mubr.msk.bf16.mxu1 %vm637_vm3, %v4085_v38  ;;  %3625 = vmatprep.mubr.msk.bf16.mxu0 %vm637_vm3, %v5048_v6  ;;  %v2430_v38 = vshll.u32 %v4810_v9, 16 }
  0xee   : > { %v2432_v18 = vrot.slane %v2430_v38, 5 }
  0xf0   : > { %v2437_v59 = vor.u32 %v2436_v43, %v2432_v18 }
  0xf2   : > { %v2438_v2 = vrot.slane %v2437_v59, 4 }
  0xf3   : > { %3474 = vmatmul.mubr.msk.bf16.vlgmr.msra.gmra.mrb[0].mxu1 %vm637_vm3, %v4574_v47  ;;  %3626 = vmatmul.mubr.msk.bf16.gmra.mrb[16].mxu0 %vm637_vm3, %v5049_v7  ;;  %v2423_v47 = vrot.slane %v2421_v60, 4 }
  0xf4   : > { %3676 = vmatpush3.bf16.msra.mxu1 %v5050_v25  ;;  %3477 = vmatprep.mubr.msk.bf16.mxu1 %vm637_vm3, %v4600_v23 }
  0xf5   : > { %3629 = vmatprep.mubr.msk.bf16.mxu0 %vm637_vm3, %v5051_v46  ;;  %v2427_v23 = vor.u32 %v2426_v32, %v2423_v47 }
  0xf7   : > { %v2428_v48 = vrot.slane %v2427_v23, 4 }
  0xfb   : > { %3478 = vmatmul.mubr.msk.bf16.gmra.mrb[4].mxu1 %vm637_vm3, %v4645_v56  ;;  %3630 = vmatmul.mubr.msk.bf16.gmra.mrb[20].mxu0 %vm637_vm3, %v5052_v12  ;;  %v2433_v56 = vsel %vm4079_vm4, %v2428_v48, %v2432_v18 }
  0xfc   : > { %3481 = vmatprep.mubr.msk.bf16.mxu1 %vm637_vm3, %v4681_v53  ;;  %3633 = vmatprep.mubr.msk.bf16.mxu0 %vm637_vm3, %v4513_v30  ;;  %v2443_v53 = vsel %vm4079_vm4, %v2438_v2, %v2442_v61 }
  0xfd   : > { %v3177_v17 = vcombine.low %v2433_v56, %v2443_v53 }
 0x103   : > { %3482 = vmatmul.mubr.msk.bf16.gmra.mrb[8].mxu1 %vm637_vm3, %v4687_v8  ;;  %3634 = vmatmul.mubr.msk.bf16.gmra.mrb[24].mxu0 %vm637_vm3, %v4540_v63 }
 0x104   : > { %3485 = vmatprep.mubr.msk.bf16.mxu1 %vm637_vm3, %v4710_v40  ;;  %3637 = vmatprep.mubr.msk.bf16.mxu0 %vm637_vm3, %v4718_v16 }
 0x10b   : > { %3486 = vmatmul.mubr.msk.bf16.gmra.mrb[12].mxu1 %vm637_vm3, %v4606_v22  ;;  %3638 = vmatmul.mubr.msk.bf16.gmra.mrb[28].mxu0 %vm637_vm3, %v3177_v17 }
 0x10c   : > { %3489 = vmatprep.mubr.msk.bf16.mxu1 %vm637_vm3, %v4616_v57  ;;  %3643 = vmatprep.mubr.msk.bf16.mxu0 %vm637_vm3, %v5035_v52 }
 0x113   : > { %3490 = vmatmul.mubr.msk.bf16.gmra.mrb[16].mxu1 %vm637_vm3, %v4625_v5  ;;  %3644 = vmatmul.mubr.msk.bf16.vlgmr.msra.gmra.mrb[0].mxu0 %vm637_vm3, %v5036_v3 }
 0x114   : > { %3493 = vmatprep.mubr.msk.bf16.mxu1 %vm637_vm3, %v4629_v49  ;;  %3647 = vmatprep.mubr.msk.bf16.mxu0 %vm637_vm3, %v5037_v4 }
 0x11b   : > { %3494 = vmatmul.mubr.msk.bf16.gmra.mrb[20].mxu1 %vm637_vm3, %v4633_v54  ;;  %3648 = vmatmul.mubr.msk.bf16.gmra.mrb[4].mxu0 %vm637_vm3, %v5038_v21 }
 0x11c   : > { %3497 = vmatprep.mubr.msk.bf16.mxu1 %vm637_vm3, %v4637_v36  ;;  %3651 = vmatprep.mubr.msk.bf16.mxu0 %vm637_vm3, %v5039_v13 }
 0x123   : > { %3498 = vmatmul.mubr.msk.bf16.gmra.mrb[24].mxu1 %vm637_vm3, %v4641_v45  ;;  %3652 = vmatmul.mubr.msk.bf16.gmra.mrb[8].mxu0 %vm637_vm3, %v4511_v37  ;;  %v3194_v37 = vrot.slane %v4807_v24, 9 }
 0x124   : > { %3501 = vmatprep.mubr.msk.bf16.mxu1 %vm637_vm3, %v4651_v29  ;;  %3655 = vmatprep.mubr.msk.bf16.mxu0 %vm637_vm3, %v4542_v41  ;;  %v2653_v41 = vrot.slane %v2651_v34, 4 }
 0x12b   : > { %3502 = vmatmul.mubr.msk.bf16.gmra.mrb[28].mxu1 %vm637_vm3, %v4796_v11  ;;  %3656 = vmatmul.mubr.msk.bf16.gmra.mrb[12].mxu0 %vm637_vm3, %v4546_v50  ;;  %v2654_v50 = vrot.slane %v198_v55, 5 }
 0x12c   : > { %3523 = vmatprep.mubr.msk.bf16.mxu1 %vm637_vm3, %v5047_v27  ;;  %3659 = vmatprep.mubr.msk.bf16.mxu0 %vm637_vm3, %v4568_v20  ;;  %v2652_v20 = vsel %vm4260_vm7, %v3194_v37, %v2651_v34 }
 0x133   : > { %3524 = vmatmul.mubr.msk.bf16.vlgmr.msra.gmra.mrb[16].mxu1 %vm637_vm3, %v5048_v6  ;;  %3660 = vmatmul.mubr.msk.bf16.gmra.mrb[16].mxu0 %vm637_vm3, %v4579_v0  ;;  %v2655_v0 = vsel %vm4260_vm7, %v2653_v41, %v2654_v50 }
 0x134   : > { %3527 = vmatprep.mubr.msk.bf16.mxu1 %vm637_vm3, %v5049_v7  ;;  %3663 = vmatprep.mubr.msk.bf16.mxu0 %vm637_vm3, %v4620_v62  ;;  %v3196_v22 = vcombine.low %v2652_v20, %v2655_v0 }
 0x13b   : > { %3528 = vmatmul.mubr.msk.bf16.gmra.mrb[20].mxu1 %vm637_vm3, %v5051_v46  ;;  %3664 = vmatmul.mubr.msk.bf16.gmra.mrb[20].mxu0 %vm637_vm3, %v4647_v31 }
 0x13c   : > { %3531 = vmatprep.mubr.msk.bf16.mxu1 %vm637_vm3, %v5052_v12  ;;  %3667 = vmatprep.mubr.msk.bf16.mxu0 %vm637_vm3, %v4683_v44 }
 0x143   : > { %3532 = vmatmul.mubr.msk.bf16.gmra.mrb[24].mxu1 %vm637_vm3, %v4513_v30  ;;  %3668 = vmatmul.mubr.msk.bf16.gmra.mrb[24].mxu0 %vm637_vm3, %v4693_v1 }
 0x144   : > { %3535 = vmatprep.mubr.msk.bf16.mxu1 %vm637_vm3, %v4540_v63  ;;  %3671 = vmatprep.mubr.msk.bf16.mxu0 %vm637_vm3, %v4712_v19 }
 0x14b   : > { %3536 = vmatmul.mubr.msk.bf16.gmra.mrb[28].mxu1 %vm637_vm3, %v4718_v16  ;;  %3672 = vmatmul.mubr.msk.bf16.gmra.mrb[28].mxu0 %vm637_vm3, %v3196_v22 }
 0x1c6   : > { %v3475_v30 = vpop.f32.mrb[0].mxu1 }
 0x1c7   : > { %v1615_v57 = vpop.f32.mrb[1].mxu1 }
 0x1c8   : > { %v3476_v62 = vpop.f32.mrb[2].mxu1 }
 0x1c9   : > { %v1618_v5 = vpop.f32.mrb[3].mxu1 }
 0x1ce   : > { %v3479_v63 = vpop.f32.mrb[4].mxu1 }
 0x1cf   : > { %v1631_v49 = vpop.f32.mrb[5].mxu1 }
 0x1d0   : > { %v3480_v54 = vpop.f32.mrb[6].mxu1 }
 0x1d1   : > { %v1634_v36 = vpop.f32.mrb[7].mxu1 }
 0x1d6   : > { %v3483_v45 = vpop.f32.mrb[8].mxu1 }
 0x1d7   : > { %v1647_v31 = vpop.f32.mrb[9].mxu1 }
 0x1d8   : > { %v3484_v29 = vpop.f32.mrb[10].mxu1 }
 0x1d9   : > { %v1650_v44 = vpop.f32.mrb[11].mxu1 }
 0x1de   : > { %v3487_v26 = vpop.f32.mrb[12].mxu1 }
 0x1df   : > { %v1663_v8 = vpop.f32.mrb[13].mxu1 }
 0x1e0   : > { %v3488_v1 = vpop.f32.mrb[14].mxu1 }
 0x1e1   : > { %v1666_v40 = vpop.f32.mrb[15].mxu1 }
 0x1e6   : > { %v3645_v19 = vpop.f32.mrb[0].mxu0 }
 0x1e7   : > { %v3677_v16 = vadd.f32 %v3645_v19, %v3475_v30  ;;  %v2701_v52 = vpop.f32.mrb[1].mxu0 }
 0x1e8   : > { %v3646_v3 = vpop.f32.mrb[2].mxu0  ;;  %v3678_v4 = vadd.f32 %v2701_v52, %v1615_v57 }
 0x1e9   : > { %v3679_v11 = vadd.f32 %v3646_v3, %v3476_v62  ;;  %v2704_v21 = vpop.f32.mrb[3].mxu0 }
 0x1ea   : > { %v3680_v13 = vadd.f32 %v2704_v21, %v1618_v5  ;;  %2860 = vxpose.xlu0.b32.start [1/16] (narrow) %v3678_v4, 8 }
 0x1ee   : > { %v3649_v24 = vpop.f32.mrb[4].mxu0  ;;  %2861 = vxpose.xlu0.b32.cont [2/16] (narrow) %v3680_v13, 8 }
 0x1ef   : > { %v3681_v9 = vadd.f32 %v3649_v24, %v3479_v63  ;;  %v2717_v10 = vpop.f32.mrb[5].mxu0 }
 0x1f0   : > { %v3682_v51 = vadd.f32 %v2717_v10, %v1631_v49  ;;  %v3650_v33 = vpop.f32.mrb[6].mxu0 }
 0x1f1   : > { %v3683_v39 = vadd.f32 %v3650_v33, %v3480_v54  ;;  %v2720_v58 = vpop.f32.mrb[7].mxu0 }
 0x1f2   : > { %v3684_v42 = vadd.f32 %v2720_v58, %v1634_v36  ;;  %2862 = vxpose.xlu0.b32.cont [3/16] (narrow) %v3677_v16, 8 }
 0x1f6   : > { %v3653_v15 = vpop.f32.mrb[8].mxu0  ;;  %2863 = vxpose.xlu0.b32.cont [4/16] (narrow) %v3679_v11, 8 }
 0x1f7   : > { %v3685_v27 = vadd.f32 %v3653_v15, %v3483_v45  ;;  %v2733_v6 = vpop.f32.mrb[9].mxu0 }
 0x1f8   : > { %v3686_v7 = vadd.f32 %v2733_v6, %v1647_v31  ;;  %v3654_v60 = vpop.f32.mrb[10].mxu0 }
 0x1f9   : > { %v3687_v14 = vadd.f32 %v3654_v60, %v3484_v29  ;;  %v2736_v28 = vpop.f32.mrb[11].mxu0 }
 0x1fa   : > { %v3688_v25 = vadd.f32 %v2736_v28, %v1650_v44  ;;  %2864 = vxpose.xlu0.b32.cont [5/16] (narrow) %v3682_v51, 8 }
 0x1fe   : > { %v3657_v38 = vpop.f32.mrb[12].mxu0  ;;  %2865 = vxpose.xlu0.b32.cont [6/16] (narrow) %v3684_v42, 8 }
 0x1ff   : > { %v4960_v46 = vadd.f32 %v3657_v38, %v3487_v26  ;;  %v2749_v47 = vpop.f32.mrb[13].mxu0 }
 0x200   : > { %v3690_v32 = vadd.f32 %v2749_v47, %v1663_v8  ;;  %v3658_v18 = vpop.f32.mrb[14].mxu0 }
 0x201   : > { %v4962_v43 = vadd.f32 %v3658_v18, %v3488_v1  ;;  %v2752_v55 = vpop.f32.mrb[15].mxu0 }
 0x202   : > { %v3692_v12 = vadd.f32 %v2752_v55, %v1666_v40  ;;  %2866 = vxpose.xlu0.b32.cont [7/16] (narrow) %v3681_v9, 8 }
 0x206   : > { %v3661_v23 = vpop.f32.mrb[16].mxu0  ;;  %2867 = vxpose.xlu0.b32.cont [8/16] (narrow) %v3683_v39, 8  ;;  %v3525_v59 = vpop.f32.mrb[16].mxu1 }
 0x207   : > { %v3693_v35 = vadd.f32 %v3661_v23, %v3525_v59  ;;  %v1907_v48 = vpop.f32.mrb[17].mxu1  ;;  %v2765_v2 = vpop.f32.mrb[17].mxu0 }
 0x208   : > { %v3526_v61 = vpop.f32.mrb[18].mxu1  ;;  %v3662_v56 = vpop.f32.mrb[18].mxu0  ;;  %v3694_v53 = vadd.f32 %v2765_v2, %v1907_v48 }
 0x209   : > { %v3695_v17 = vadd.f32 %v3662_v56, %v3526_v61  ;;  %v1910_v34 = vpop.f32.mrb[19].mxu1  ;;  %v2768_v37 = vpop.f32.mrb[19].mxu0 }
 0x20a   : > { %v3696_v41 = vadd.f32 %v2768_v37, %v1910_v34  ;;  %2868 = vxpose.xlu0.b32.cont [9/16] (narrow) %v3686_v7, 8  ;;  %2892 = vxpose.xlu1.b32.start [1/16] (narrow) %v3694_v53, 8 }
 0x20e   : > { %v3665_v50 = vpop.f32.mrb[20].mxu0  ;;  %2869 = vxpose.xlu0.b32.cont [10/16] (narrow) %v3688_v25, 8  ;;  %2893 = vxpose.xlu1.b32.cont [2/16] (narrow) %v3696_v41, 8  ;;  %v3529_v20 = vpop.f32.mrb[20].mxu1 }
 0x20f   : > { %v3697_v0 = vadd.f32 %v3665_v50, %v3529_v20  ;;  %v1923_v22 = vpop.f32.mrb[21].mxu1  ;;  %v2781_v30 = vpop.f32.mrb[21].mxu0 }
 0x210   : > { %v3698_v57 = vadd.f32 %v2781_v30, %v1923_v22  ;;  %v3530_v62 = vpop.f32.mrb[22].mxu1  ;;  %v3666_v5 = vpop.f32.mrb[22].mxu0 }
 0x211   : > { %v3699_v63 = vadd.f32 %v3666_v5, %v3530_v62  ;;  %v1926_v49 = vpop.f32.mrb[23].mxu1  ;;  %v2784_v54 = vpop.f32.mrb[23].mxu0 }
 0x212   : > { %v3700_v36 = vadd.f32 %v2784_v54, %v1926_v49  ;;  %2870 = vxpose.xlu0.b32.cont [11/16] (narrow) %v3685_v27, 8  ;;  %2894 = vxpose.xlu1.b32.cont [3/16] (narrow) %v3693_v35, 8 }
 0x216   : > { %v3669_v45 = vpop.f32.mrb[24].mxu0  ;;  %2871 = vxpose.xlu0.b32.cont [12/16] (narrow) %v3687_v14, 8  ;;  %2895 = vxpose.xlu1.b32.cont [4/16] (narrow) %v3695_v17, 8  ;;  %v3533_v31 = vpop.f32.mrb[24].mxu1 }
 0x217   : > { %v3701_v29 = vadd.f32 %v3669_v45, %v3533_v31  ;;  %v1939_v44 = vpop.f32.mrb[25].mxu1  ;;  %v2797_v26 = vpop.f32.mrb[25].mxu0 }
 0x218   : > { %v3702_v8 = vadd.f32 %v2797_v26, %v1939_v44  ;;  %v3534_v1 = vpop.f32.mrb[26].mxu1  ;;  %v3670_v40 = vpop.f32.mrb[26].mxu0 }
 0x219   : > { %v3703_v19 = vadd.f32 %v3670_v40, %v3534_v1  ;;  %v1942_v16 = vpop.f32.mrb[27].mxu1  ;;  %v2800_v52 = vpop.f32.mrb[27].mxu0 }
 0x21a   : > { %v3704_v3 = vadd.f32 %v2800_v52, %v1942_v16  ;;  %2872 = vxpose.xlu0.b32.cont [13/16] (narrow) %v3690_v32, 8  ;;  %2896 = vxpose.xlu1.b32.cont [5/16] (narrow) %v3698_v57, 8 }
 0x21e   : > { %v3673_v4 = vpop.f32.mrb[28].mxu0  ;;  %2873 = vxpose.xlu0.b32.cont [14/16] (narrow) %v3692_v12, 8  ;;  %2897 = vxpose.xlu1.b32.cont [6/16] (narrow) %v3700_v36, 8  ;;  %v3537_v11 = vpop.f32.mrb[28].mxu1 }
 0x21f   : > { %v3705_v21 = vadd.f32 %v3673_v4, %v3537_v11  ;;  %v1955_v13 = vpop.f32.mrb[29].mxu1  ;;  %v2813_v24 = vpop.f32.mrb[29].mxu0 }
 0x220   : > { %v3706_v9 = vadd.f32 %v2813_v24, %v1955_v13  ;;  %v3538_v10 = vpop.f32.mrb[30].mxu1  ;;  %v3674_v51 = vpop.f32.mrb[30].mxu0 }
 0x221   : > { %v3707_v33 = vadd.f32 %v3674_v51, %v3538_v10  ;;  %v1958_v39 = vpop.f32.mrb[31].mxu1  ;;  %v2816_v58 = vpop.f32.mrb[31].mxu0 }
 0x222   : > { %v3708_v42 = vadd.f32 %v2816_v58, %v1958_v39  ;;  %2874 = vxpose.xlu0.b32.cont [15/16] (narrow) %v4960_v46, 8  ;;  %2898 = vxpose.xlu1.b32.cont [7/16] (narrow) %v3697_v0, 8 }
 0x226   : > { %2875 = vxpose.xlu0.b32.end [16/16] (narrow) %v4962_v43, 8  ;;  %2899 = vxpose.xlu1.b32.cont [8/16] (narrow) %v3699_v63, 8 }
 0x22a   : > { %2900 = vxpose.xlu1.b32.cont [9/16] (narrow) %v3702_v8, 8 }
 0x22e   : > { %2901 = vxpose.xlu1.b32.cont [10/16] (narrow) %v3704_v3, 8 }
 0x232   : > { %2902 = vxpose.xlu1.b32.cont [11/16] (narrow) %v3701_v29, 8 }
 0x236   : > { %2903 = vxpose.xlu1.b32.cont [12/16] (narrow) %v3703_v19, 8 }
 0x23a   : > { %2904 = vxpose.xlu1.b32.cont [13/16] (narrow) %v3706_v9, 8 }
 0x23e   : > { %2905 = vxpose.xlu1.b32.cont [14/16] (narrow) %v3708_v42, 8 }
 0x242   : > { %2906 = vxpose.xlu1.b32.cont [15/16] (narrow) %v3705_v21, 8 }
 0x246   : > { %2907 = vxpose.xlu1.b32.end [16/16] (narrow) %v3707_v33, 8 }
 0x26a   : > { %v2876_v15 = vpop.trf.xlu0 }
 0x26b   : > { %2924 = vst [vmem:[%s143_s12] sm:$0xff] %v2876_v15 }
 0x28a   : > { %v2908_v27 = vpop.trf.xlu1 }
 0x28b   : > { %2925 = vst [vmem:[%s143_s12 + $0x8] sm:$0xff] %v2908_v27 }
 0x28c PF: > { %s12_s9 = sadd.s32 1, %s3980_s9  }
 0x28d   : > { %p9_p4 = scmp.ge.s32.totalorder %s12_s9, 4  }
 0x28f   :  { %11 = sbr.rel (!%p9_p4) target bundleno = 1 (0x1), region = 66 }

</bundles_post_ra>
